<compile_context>
chip_gen: v7x
topology: tpu7x:2x2x1
jax: 0.10.0
libtpu: 0.0.40
codegen_flags: <defaults>
</compile_context>

<pallas_src>
import jax
import jax.numpy as jnp
from jax.experimental import pallas as pl
from jax.experimental.pallas import tpu as pltpu


def _diffeq_kernel(dt_ref,            # (T,) f32 in SMEM; dt[i] = t[i+1]-t[i] (last unused)
                   y0_ref,            # (N, D) initial state, VMEM
                   w1_ref, b1_ref,    # (D, H), (1, H)
                   w2_ref, b2_ref,    # (H, D), (1, D)
                   out_ref):          # (N, T*D) lane-dense trajectory output
    N, D = y0_ref.shape
    H = w1_ref.shape[1]
    T = out_ref.shape[1] // D

    # Load weights once; hoist bias broadcasts out of f() (not CSE'd otherwise).
    w1 = w1_ref[...]
    w2 = w2_ref[...]
    b1 = jnp.broadcast_to(b1_ref[...], (N, H))
    b2 = jnp.broadcast_to(b2_ref[...], (N, D))

    def f(yv):
        h = jnp.tanh(jnp.dot(yv, w1, preferred_element_type=jnp.float32) + b1)
        return jnp.dot(h, w2, preferred_element_type=jnp.float32) + b2

    # State carried in vregs across the (fully unrolled) time loop.
    y = y0_ref[...].astype(jnp.float32)
    out_ref[:, 0:D] = y.astype(out_ref.dtype)

    one_third = jnp.float32(1.0 / 3.0)
    one_eighth = jnp.float32(0.125)
    for t in range(T - 1):
        dt = dt_ref[t]
        dt_third = dt * one_third      # strength-reduced: no divides on the RK chain
        dt_eighth = dt * one_eighth
        # torchdiffeq "rk4" = 3/8-rule fixed step (rk4_alt_step_func).
        k1 = f(y)
        k2 = f(y + dt_third * k1)
        k3 = f(y + dt * k2 - dt_third * k1)
        k4 = f(y + dt * (k1 - k2 + k3))
        y = y + dt_eighth * (k1 + 3.0 * (k2 + k3) + k4)
        out_ref[:, (t + 1) * D:(t + 2) * D] = y.astype(out_ref.dtype)


def diffeq_solver_forward(first_point, time_steps, w1, b1, w2, b2):
    """first_point: (S, B, D); time_steps: (T,).  Returns (S, B, T, D)."""
    S, B, D = first_point.shape
    T = time_steps.shape[0]
    N = S * B
    H = w1.shape[1]

    y0 = first_point.reshape(N, D)
    # dt[i] = t[i+1] - t[i]; padded so the array has length T (last entry unused).
    dts = jnp.concatenate(
        [time_steps[1:] - time_steps[:-1], jnp.zeros((1,), time_steps.dtype)]
    ).astype(jnp.float32)

    out = pl.pallas_call(
        _diffeq_kernel,
        out_shape=jax.ShapeDtypeStruct((N, T * D), first_point.dtype),
        in_specs=[
            pl.BlockSpec(memory_space=pltpu.MemorySpace.SMEM),   # dts (scalars)
            pl.BlockSpec(memory_space=pltpu.MemorySpace.VMEM),   # y0
            pl.BlockSpec(memory_space=pltpu.MemorySpace.VMEM),   # w1
            pl.BlockSpec(memory_space=pltpu.MemorySpace.VMEM),   # b1
            pl.BlockSpec(memory_space=pltpu.MemorySpace.VMEM),   # w2
            pl.BlockSpec(memory_space=pltpu.MemorySpace.VMEM),   # b2
        ],
        out_specs=pl.BlockSpec(memory_space=pltpu.MemorySpace.VMEM),
    )(dts, y0, w1, b1.reshape(1, H), w2, b2.reshape(1, D))

    # Row n of `out` is trajectory n laid out time-major: [y(t0), y(t1), ...].
    # (N, T*D) -> (S, B, T, D) directly; no transpose needed.
    return out.reshape(S, B, T, D)


def _reference_forward(first_point, time_steps, w1, b1, w2, b2):
    """Pure-JAX reference (same fixed-grid 3/8-rule RK4 as torchdiffeq 'rk4')."""
    def f(y):
        return jnp.tanh(y @ w1 + b1) @ w2 + b2

    def step(y, dt):
        k1 = f(y)
        k2 = f(y + dt * (k1 / 3.0))
        k3 = f(y + dt * (k2 - k1 / 3.0))
        k4 = f(y + dt * (k1 - k2 + k3))
        y_new = y + dt * (k1 + 3.0 * (k2 + k3) + k4) * 0.125
        return y_new, y_new

    dts = time_steps[1:] - time_steps[:-1]
    _, ys = jax.lax.scan(step, first_point, dts)
    pred = jnp.concatenate([first_point[None], ys], axis=0)  # (T, S, B, D)
    return pred.transpose(1, 2, 0, 3)


if __name__ == "__main__":
    key = jax.random.PRNGKey(0)
    k0, k1, k2, k3, k4, k5 = jax.random.split(key, 6)

    S, B, D, H, T = 2, 4, 32, 64, 8  # n_traj_samples, n_traj, latent, hidden, time steps

    first_point = jax.random.normal(k0, (S, B, D), dtype=jnp.float32)
    time_steps = jnp.linspace(0.0, 1.0, T, dtype=jnp.float32)

    # Deterministic synthetic ODE-func (2-layer MLP) parameters.
    w1 = jax.random.normal(k1, (D, H), dtype=jnp.float32) * 0.1
    b1 = jax.random.normal(k2, (H,), dtype=jnp.float32) * 0.01
    w2 = jax.random.normal(k3, (H, D), dtype=jnp.float32) * 0.1
    b2 = jax.random.normal(k4, (D,), dtype=jnp.float32) * 0.01

    pred_y = diffeq_solver_forward(first_point, time_steps, w1, b1, w2, b2)
    pred_y = jax.block_until_ready(pred_y)

    assert pred_y.shape == (S, B, T, D), pred_y.shape

    ref = _reference_forward(first_point, time_steps, w1, b1, w2, b2)
    ref = jax.block_until_ready(ref)
    assert jnp.allclose(pred_y, ref, rtol=1e-4, atol=1e-5), (
        float(jnp.max(jnp.abs(pred_y - ref)))
    )

    print("KERNEL_OK")
</pallas_src>

<mosaic_0001>
module attributes {stable_mosaic.version = 11 : i64} {
  func.func @_diffeq_kernel(%arg0: memref<8xf32, #tpu.memory_space<smem>>, %arg1: memref<8x32xf32, #tpu.memory_space<vmem>>, %arg2: memref<32x64xf32, #tpu.memory_space<vmem>>, %arg3: memref<1x64xf32, #tpu.memory_space<vmem>>, %arg4: memref<64x32xf32, #tpu.memory_space<vmem>>, %arg5: memref<1x32xf32, #tpu.memory_space<vmem>>, %arg6: memref<8x256xf32, #tpu.memory_space<vmem>>) attributes {dimension_semantics = [], scalar_prefetch = 0 : i64, scratch_operands = 0 : i64, tpu.core_type = #tpu.core_type<tc>} {
    %c0 = arith.constant 0 : index
    %c0_0 = arith.constant 0 : index
    %0 = vector.load %arg2[%c0, %c0_0] : memref<32x64xf32, #tpu.memory_space<vmem>>, vector<32x64xf32>
    %c0_1 = arith.constant 0 : index
    %c0_2 = arith.constant 0 : index
    %1 = vector.load %arg4[%c0_1, %c0_2] : memref<64x32xf32, #tpu.memory_space<vmem>>, vector<64x32xf32>
    %c0_3 = arith.constant 0 : index
    %c0_4 = arith.constant 0 : index
    %2 = vector.load %arg3[%c0_3, %c0_4] : memref<1x64xf32, #tpu.memory_space<vmem>>, vector<1x64xf32>
    %3 = vector.shape_cast %2 : vector<1x64xf32> to vector<1x64xf32>
    %4 = vector.broadcast %3 : vector<1x64xf32> to vector<8x64xf32>
    %c0_5 = arith.constant 0 : index
    %c0_6 = arith.constant 0 : index
    %5 = vector.load %arg5[%c0_5, %c0_6] : memref<1x32xf32, #tpu.memory_space<vmem>>, vector<1x32xf32>
    %6 = vector.shape_cast %5 : vector<1x32xf32> to vector<1x32xf32>
    %7 = vector.broadcast %6 : vector<1x32xf32> to vector<8x32xf32>
    %c0_7 = arith.constant 0 : index
    %c0_8 = arith.constant 0 : index
    %8 = vector.load %arg1[%c0_7, %c0_8] : memref<8x32xf32, #tpu.memory_space<vmem>>, vector<8x32xf32>
    %c0_9 = arith.constant 0 : index
    %c0_10 = arith.constant 0 : index
    %9 = vector.load %arg6[%c0_9, %c0_10] : memref<8x256xf32, #tpu.memory_space<vmem>>, vector<8x32xf32>
    tpu.vector_store %arg6[%c0_9, %c0_10], %8 {strides = array<i32>} : memref<8x256xf32, #tpu.memory_space<vmem>>, vector<8x32xf32>,
    %c0_11 = arith.constant 0 : index
    %10 = memref.load %arg0[%c0_11] : memref<8xf32, #tpu.memory_space<smem>>
    %cst = arith.constant 0.333333343 : f32
    %11 = arith.mulf %10, %cst : f32
    %cst_12 = arith.constant 1.250000e-01 : f32
    %12 = arith.mulf %10, %cst_12 : f32
    %cst_13 = arith.constant dense<0.000000e+00> : vector<8x64xf32>
    %13 = tpu.matmul %8, %0, %cst_13 {dimension_numbers = #tpu.dot_dimension_numbers<[1], [0], [0], [1], [0, 0, 1, 1], [], []>} : vector<8x32xf32>, vector<32x64xf32>, vector<8x64xf32> -> vector<8x64xf32>
    %14 = arith.addf %13, %4 : vector<8x64xf32>
    %15 = math.tanh %14 : vector<8x64xf32>
    %cst_14 = arith.constant dense<0.000000e+00> : vector<8x32xf32>
    %16 = tpu.matmul %15, %1, %cst_14 {dimension_numbers = #tpu.dot_dimension_numbers<[1], [0], [0], [1], [0, 0, 1, 1], [], []>} : vector<8x64xf32>, vector<64x32xf32>, vector<8x32xf32> -> vector<8x32xf32>
    %17 = arith.addf %16, %7 : vector<8x32xf32>
    %18 = vector.broadcast %11 : f32 to vector<8x32xf32>
    %19 = arith.mulf %18, %17 : vector<8x32xf32>
    %20 = arith.addf %8, %19 : vector<8x32xf32>
    %cst_15 = arith.constant dense<0.000000e+00> : vector<8x64xf32>
    %21 = tpu.matmul %20, %0, %cst_15 {dimension_numbers = #tpu.dot_dimension_numbers<[1], [0], [0], [1], [0, 0, 1, 1], [], []>} : vector<8x32xf32>, vector<32x64xf32>, vector<8x64xf32> -> vector<8x64xf32>
    %22 = arith.addf %21, %4 : vector<8x64xf32>
    %23 = math.tanh %22 : vector<8x64xf32>
    %cst_16 = arith.constant dense<0.000000e+00> : vector<8x32xf32>
    %24 = tpu.matmul %23, %1, %cst_16 {dimension_numbers = #tpu.dot_dimension_numbers<[1], [0], [0], [1], [0, 0, 1, 1], [], []>} : vector<8x64xf32>, vector<64x32xf32>, vector<8x32xf32> -> vector<8x32xf32>
    %25 = arith.addf %24, %7 : vector<8x32xf32>
    %26 = vector.broadcast %10 : f32 to vector<8x32xf32>
    %27 = arith.mulf %26, %25 : vector<8x32xf32>
    %28 = arith.addf %8, %27 : vector<8x32xf32>
    %29 = vector.broadcast %11 : f32 to vector<8x32xf32>
    %30 = arith.mulf %29, %17 : vector<8x32xf32>
    %31 = arith.subf %28, %30 : vector<8x32xf32>
    %cst_17 = arith.constant dense<0.000000e+00> : vector<8x64xf32>
    %32 = tpu.matmul %31, %0, %cst_17 {dimension_numbers = #tpu.dot_dimension_numbers<[1], [0], [0], [1], [0, 0, 1, 1], [], []>} : vector<8x32xf32>, vector<32x64xf32>, vector<8x64xf32> -> vector<8x64xf32>
    %33 = arith.addf %32, %4 : vector<8x64xf32>
    %34 = math.tanh %33 : vector<8x64xf32>
    %cst_18 = arith.constant dense<0.000000e+00> : vector<8x32xf32>
    %35 = tpu.matmul %34, %1, %cst_18 {dimension_numbers = #tpu.dot_dimension_numbers<[1], [0], [0], [1], [0, 0, 1, 1], [], []>} : vector<8x64xf32>, vector<64x32xf32>, vector<8x32xf32> -> vector<8x32xf32>
    %36 = arith.addf %35, %7 : vector<8x32xf32>
    %37 = arith.subf %17, %25 : vector<8x32xf32>
    %38 = arith.addf %37, %36 : vector<8x32xf32>
    %39 = vector.broadcast %10 : f32 to vector<8x32xf32>
    %40 = arith.mulf %39, %38 : vector<8x32xf32>
    %41 = arith.addf %8, %40 : vector<8x32xf32>
    %cst_19 = arith.constant dense<0.000000e+00> : vector<8x64xf32>
    %42 = tpu.matmul %41, %0, %cst_19 {dimension_numbers = #tpu.dot_dimension_numbers<[1], [0], [0], [1], [0, 0, 1, 1], [], []>} : vector<8x32xf32>, vector<32x64xf32>, vector<8x64xf32> -> vector<8x64xf32>
    %43 = arith.addf %42, %4 : vector<8x64xf32>
    %44 = math.tanh %43 : vector<8x64xf32>
    %cst_20 = arith.constant dense<0.000000e+00> : vector<8x32xf32>
    %45 = tpu.matmul %44, %1, %cst_20 {dimension_numbers = #tpu.dot_dimension_numbers<[1], [0], [0], [1], [0, 0, 1, 1], [], []>} : vector<8x64xf32>, vector<64x32xf32>, vector<8x32xf32> -> vector<8x32xf32>
    %46 = arith.addf %45, %7 : vector<8x32xf32>
    %47 = arith.addf %25, %36 : vector<8x32xf32>
    %cst_21 = arith.constant 3.000000e+00 : f32
    %48 = vector.broadcast %cst_21 : f32 to vector<8x32xf32>
    %49 = arith.mulf %48, %47 : vector<8x32xf32>
    %50 = arith.addf %17, %49 : vector<8x32xf32>
    %51 = arith.addf %50, %46 : vector<8x32xf32>
    %52 = vector.broadcast %12 : f32 to vector<8x32xf32>
    %53 = arith.mulf %52, %51 : vector<8x32xf32>
    %54 = arith.addf %8, %53 : vector<8x32xf32>
    %c0_22 = arith.constant 0 : index
    %c32 = arith.constant 32 : index
    %55 = vector.load %arg6[%c0_22, %c32] : memref<8x256xf32, #tpu.memory_space<vmem>>, vector<8x32xf32>
    tpu.vector_store %arg6[%c0_22, %c32], %54 {strides = array<i32>} : memref<8x256xf32, #tpu.memory_space<vmem>>, vector<8x32xf32>,
    %c1 = arith.constant 1 : index
    %56 = memref.load %arg0[%c1] : memref<8xf32, #tpu.memory_space<smem>>
    %cst_23 = arith.constant 0.333333343 : f32
    %57 = arith.mulf %56, %cst_23 : f32
    %cst_24 = arith.constant 1.250000e-01 : f32
    %58 = arith.mulf %56, %cst_24 : f32
    %cst_25 = arith.constant dense<0.000000e+00> : vector<8x64xf32>
    %59 = tpu.matmul %54, %0, %cst_25 {dimension_numbers = #tpu.dot_dimension_numbers<[1], [0], [0], [1], [0, 0, 1, 1], [], []>} : vector<8x32xf32>, vector<32x64xf32>, vector<8x64xf32> -> vector<8x64xf32>
    %60 = arith.addf %59, %4 : vector<8x64xf32>
    %61 = math.tanh %60 : vector<8x64xf32>
    %cst_26 = arith.constant dense<0.000000e+00> : vector<8x32xf32>
    %62 = tpu.matmul %61, %1, %cst_26 {dimension_numbers = #tpu.dot_dimension_numbers<[1], [0], [0], [1], [0, 0, 1, 1], [], []>} : vector<8x64xf32>, vector<64x32xf32>, vector<8x32xf32> -> vector<8x32xf32>
    %63 = arith.addf %62, %7 : vector<8x32xf32>
    %64 = vector.broadcast %57 : f32 to vector<8x32xf32>
    %65 = arith.mulf %64, %63 : vector<8x32xf32>
    %66 = arith.addf %54, %65 : vector<8x32xf32>
    %cst_27 = arith.constant dense<0.000000e+00> : vector<8x64xf32>
    %67 = tpu.matmul %66, %0, %cst_27 {dimension_numbers = #tpu.dot_dimension_numbers<[1], [0], [0], [1], [0, 0, 1, 1], [], []>} : vector<8x32xf32>, vector<32x64xf32>, vector<8x64xf32> -> vector<8x64xf32>
    %68 = arith.addf %67, %4 : vector<8x64xf32>
    %69 = math.tanh %68 : vector<8x64xf32>
    %cst_28 = arith.constant dense<0.000000e+00> : vector<8x32xf32>
    %70 = tpu.matmul %69, %1, %cst_28 {dimension_numbers = #tpu.dot_dimension_numbers<[1], [0], [0], [1], [0, 0, 1, 1], [], []>} : vector<8x64xf32>, vector<64x32xf32>, vector<8x32xf32> -> vector<8x32xf32>
    %71 = arith.addf %70, %7 : vector<8x32xf32>
    %72 = vector.broadcast %56 : f32 to vector<8x32xf32>
    %73 = arith.mulf %72, %71 : vector<8x32xf32>
    %74 = arith.addf %54, %73 : vector<8x32xf32>
    %75 = vector.broadcast %57 : f32 to vector<8x32xf32>
    %76 = arith.mulf %75, %63 : vector<8x32xf32>
    %77 = arith.subf %74, %76 : vector<8x32xf32>
    %cst_29 = arith.constant dense<0.000000e+00> : vector<8x64xf32>
    %78 = tpu.matmul %77, %0, %cst_29 {dimension_numbers = #tpu.dot_dimension_numbers<[1], [0], [0], [1], [0, 0, 1, 1], [], []>} : vector<8x32xf32>, vector<32x64xf32>, vector<8x64xf32> -> vector<8x64xf32>
    %79 = arith.addf %78, %4 : vector<8x64xf32>
    %80 = math.tanh %79 : vector<8x64xf32>
    %cst_30 = arith.constant dense<0.000000e+00> : vector<8x32xf32>
    %81 = tpu.matmul %80, %1, %cst_30 {dimension_numbers = #tpu.dot_dimension_numbers<[1], [0], [0], [1], [0, 0, 1, 1], [], []>} : vector<8x64xf32>, vector<64x32xf32>, vector<8x32xf32> -> vector<8x32xf32>
    %82 = arith.addf %81, %7 : vector<8x32xf32>
    %83 = arith.subf %63, %71 : vector<8x32xf32>
    %84 = arith.addf %83, %82 : vector<8x32xf32>
    %85 = vector.broadcast %56 : f32 to vector<8x32xf32>
    %86 = arith.mulf %85, %84 : vector<8x32xf32>
    %87 = arith.addf %54, %86 : vector<8x32xf32>
    %cst_31 = arith.constant dense<0.000000e+00> : vector<8x64xf32>
    %88 = tpu.matmul %87, %0, %cst_31 {dimension_numbers = #tpu.dot_dimension_numbers<[1], [0], [0], [1], [0, 0, 1, 1], [], []>} : vector<8x32xf32>, vector<32x64xf32>, vector<8x64xf32> -> vector<8x64xf32>
    %89 = arith.addf %88, %4 : vector<8x64xf32>
    %90 = math.tanh %89 : vector<8x64xf32>
    %cst_32 = arith.constant dense<0.000000e+00> : vector<8x32xf32>
    %91 = tpu.matmul %90, %1, %cst_32 {dimension_numbers = #tpu.dot_dimension_numbers<[1], [0], [0], [1], [0, 0, 1, 1], [], []>} : vector<8x64xf32>, vector<64x32xf32>, vector<8x32xf32> -> vector<8x32xf32>
    %92 = arith.addf %91, %7 : vector<8x32xf32>
    %93 = arith.addf %71, %82 : vector<8x32xf32>
    %cst_33 = arith.constant 3.000000e+00 : f32
    %94 = vector.broadcast %cst_33 : f32 to vector<8x32xf32>
    %95 = arith.mulf %94, %93 : vector<8x32xf32>
    %96 = arith.addf %63, %95 : vector<8x32xf32>
    %97 = arith.addf %96, %92 : vector<8x32xf32>
    %98 = vector.broadcast %58 : f32 to vector<8x32xf32>
    %99 = arith.mulf %98, %97 : vector<8x32xf32>
    %100 = arith.addf %54, %99 : vector<8x32xf32>
    %c0_34 = arith.constant 0 : index
    %c64 = arith.constant 64 : index
    %101 = vector.load %arg6[%c0_34, %c64] : memref<8x256xf32, #tpu.memory_space<vmem>>, vector<8x32xf32>
    tpu.vector_store %arg6[%c0_34, %c64], %100 {strides = array<i32>} : memref<8x256xf32, #tpu.memory_space<vmem>>, vector<8x32xf32>,
    %c2 = arith.constant 2 : index
    %102 = memref.load %arg0[%c2] : memref<8xf32, #tpu.memory_space<smem>>
    %cst_35 = arith.constant 0.333333343 : f32
    %103 = arith.mulf %102, %cst_35 : f32
    %cst_36 = arith.constant 1.250000e-01 : f32
    %104 = arith.mulf %102, %cst_36 : f32
    %cst_37 = arith.constant dense<0.000000e+00> : vector<8x64xf32>
    %105 = tpu.matmul %100, %0, %cst_37 {dimension_numbers = #tpu.dot_dimension_numbers<[1], [0], [0], [1], [0, 0, 1, 1], [], []>} : vector<8x32xf32>, vector<32x64xf32>, vector<8x64xf32> -> vector<8x64xf32>
    %106 = arith.addf %105, %4 : vector<8x64xf32>
    %107 = math.tanh %106 : vector<8x64xf32>
    %cst_38 = arith.constant dense<0.000000e+00> : vector<8x32xf32>
    %108 = tpu.matmul %107, %1, %cst_38 {dimension_numbers = #tpu.dot_dimension_numbers<[1], [0], [0], [1], [0, 0, 1, 1], [], []>} : vector<8x64xf32>, vector<64x32xf32>, vector<8x32xf32> -> vector<8x32xf32>
    %109 = arith.addf %108, %7 : vector<8x32xf32>
    %110 = vector.broadcast %103 : f32 to vector<8x32xf32>
    %111 = arith.mulf %110, %109 : vector<8x32xf32>
    %112 = arith.addf %100, %111 : vector<8x32xf32>
    %cst_39 = arith.constant dense<0.000000e+00> : vector<8x64xf32>
    %113 = tpu.matmul %112, %0, %cst_39 {dimension_numbers = #tpu.dot_dimension_numbers<[1], [0], [0], [1], [0, 0, 1, 1], [], []>} : vector<8x32xf32>, vector<32x64xf32>, vector<8x64xf32> -> vector<8x64xf32>
    %114 = arith.addf %113, %4 : vector<8x64xf32>
    %115 = math.tanh %114 : vector<8x64xf32>
    %cst_40 = arith.constant dense<0.000000e+00> : vector<8x32xf32>
    %116 = tpu.matmul %115, %1, %cst_40 {dimension_numbers = #tpu.dot_dimension_numbers<[1], [0], [0], [1], [0, 0, 1, 1], [], []>} : vector<8x64xf32>, vector<64x32xf32>, vector<8x32xf32> -> vector<8x32xf32>
    %117 = arith.addf %116, %7 : vector<8x32xf32>
    %118 = vector.broadcast %102 : f32 to vector<8x32xf32>
    %119 = arith.mulf %118, %117 : vector<8x32xf32>
    %120 = arith.addf %100, %119 : vector<8x32xf32>
    %121 = vector.broadcast %103 : f32 to vector<8x32xf32>
    %122 = arith.mulf %121, %109 : vector<8x32xf32>
    %123 = arith.subf %120, %122 : vector<8x32xf32>
    %cst_41 = arith.constant dense<0.000000e+00> : vector<8x64xf32>
    %124 = tpu.matmul %123, %0, %cst_41 {dimension_numbers = #tpu.dot_dimension_numbers<[1], [0], [0], [1], [0, 0, 1, 1], [], []>} : vector<8x32xf32>, vector<32x64xf32>, vector<8x64xf32> -> vector<8x64xf32>
    %125 = arith.addf %124, %4 : vector<8x64xf32>
    %126 = math.tanh %125 : vector<8x64xf32>
    %cst_42 = arith.constant dense<0.000000e+00> : vector<8x32xf32>
    %127 = tpu.matmul %126, %1, %cst_42 {dimension_numbers = #tpu.dot_dimension_numbers<[1], [0], [0], [1], [0, 0, 1, 1], [], []>} : vector<8x64xf32>, vector<64x32xf32>, vector<8x32xf32> -> vector<8x32xf32>
    %128 = arith.addf %127, %7 : vector<8x32xf32>
    %129 = arith.subf %109, %117 : vector<8x32xf32>
    %130 = arith.addf %129, %128 : vector<8x32xf32>
    %131 = vector.broadcast %102 : f32 to vector<8x32xf32>
    %132 = arith.mulf %131, %130 : vector<8x32xf32>
    %133 = arith.addf %100, %132 : vector<8x32xf32>
    %cst_43 = arith.constant dense<0.000000e+00> : vector<8x64xf32>
    %134 = tpu.matmul %133, %0, %cst_43 {dimension_numbers = #tpu.dot_dimension_numbers<[1], [0], [0], [1], [0, 0, 1, 1], [], []>} : vector<8x32xf32>, vector<32x64xf32>, vector<8x64xf32> -> vector<8x64xf32>
    %135 = arith.addf %134, %4 : vector<8x64xf32>
    %136 = math.tanh %135 : vector<8x64xf32>
    %cst_44 = arith.constant dense<0.000000e+00> : vector<8x32xf32>
    %137 = tpu.matmul %136, %1, %cst_44 {dimension_numbers = #tpu.dot_dimension_numbers<[1], [0], [0], [1], [0, 0, 1, 1], [], []>} : vector<8x64xf32>, vector<64x32xf32>, vector<8x32xf32> -> vector<8x32xf32>
    %138 = arith.addf %137, %7 : vector<8x32xf32>
    %139 = arith.addf %117, %128 : vector<8x32xf32>
    %cst_45 = arith.constant 3.000000e+00 : f32
    %140 = vector.broadcast %cst_45 : f32 to vector<8x32xf32>
    %141 = arith.mulf %140, %139 : vector<8x32xf32>
    %142 = arith.addf %109, %141 : vector<8x32xf32>
    %143 = arith.addf %142, %138 : vector<8x32xf32>
    %144 = vector.broadcast %104 : f32 to vector<8x32xf32>
    %145 = arith.mulf %144, %143 : vector<8x32xf32>
    %146 = arith.addf %100, %145 : vector<8x32xf32>
    %c0_46 = arith.constant 0 : index
    %c96 = arith.constant 96 : index
    %147 = vector.load %arg6[%c0_46, %c96] : memref<8x256xf32, #tpu.memory_space<vmem>>, vector<8x32xf32>
    tpu.vector_store %arg6[%c0_46, %c96], %146 {strides = array<i32>} : memref<8x256xf32, #tpu.memory_space<vmem>>, vector<8x32xf32>,
    %c3 = arith.constant 3 : index
    %148 = memref.load %arg0[%c3] : memref<8xf32, #tpu.memory_space<smem>>
    %cst_47 = arith.constant 0.333333343 : f32
    %149 = arith.mulf %148, %cst_47 : f32
    %cst_48 = arith.constant 1.250000e-01 : f32
    %150 = arith.mulf %148, %cst_48 : f32
    %cst_49 = arith.constant dense<0.000000e+00> : vector<8x64xf32>
    %151 = tpu.matmul %146, %0, %cst_49 {dimension_numbers = #tpu.dot_dimension_numbers<[1], [0], [0], [1], [0, 0, 1, 1], [], []>} : vector<8x32xf32>, vector<32x64xf32>, vector<8x64xf32> -> vector<8x64xf32>
    %152 = arith.addf %151, %4 : vector<8x64xf32>
    %153 = math.tanh %152 : vector<8x64xf32>
    %cst_50 = arith.constant dense<0.000000e+00> : vector<8x32xf32>
    %154 = tpu.matmul %153, %1, %cst_50 {dimension_numbers = #tpu.dot_dimension_numbers<[1], [0], [0], [1], [0, 0, 1, 1], [], []>} : vector<8x64xf32>, vector<64x32xf32>, vector<8x32xf32> -> vector<8x32xf32>
    %155 = arith.addf %154, %7 : vector<8x32xf32>
    %156 = vector.broadcast %149 : f32 to vector<8x32xf32>
    %157 = arith.mulf %156, %155 : vector<8x32xf32>
    %158 = arith.addf %146, %157 : vector<8x32xf32>
    %cst_51 = arith.constant dense<0.000000e+00> : vector<8x64xf32>
    %159 = tpu.matmul %158, %0, %cst_51 {dimension_numbers = #tpu.dot_dimension_numbers<[1], [0], [0], [1], [0, 0, 1, 1], [], []>} : vector<8x32xf32>, vector<32x64xf32>, vector<8x64xf32> -> vector<8x64xf32>
    %160 = arith.addf %159, %4 : vector<8x64xf32>
    %161 = math.tanh %160 : vector<8x64xf32>
    %cst_52 = arith.constant dense<0.000000e+00> : vector<8x32xf32>
    %162 = tpu.matmul %161, %1, %cst_52 {dimension_numbers = #tpu.dot_dimension_numbers<[1], [0], [0], [1], [0, 0, 1, 1], [], []>} : vector<8x64xf32>, vector<64x32xf32>, vector<8x32xf32> -> vector<8x32xf32>
    %163 = arith.addf %162, %7 : vector<8x32xf32>
    %164 = vector.broadcast %148 : f32 to vector<8x32xf32>
    %165 = arith.mulf %164, %163 : vector<8x32xf32>
    %166 = arith.addf %146, %165 : vector<8x32xf32>
    %167 = vector.broadcast %149 : f32 to vector<8x32xf32>
    %168 = arith.mulf %167, %155 : vector<8x32xf32>
    %169 = arith.subf %166, %168 : vector<8x32xf32>
    %cst_53 = arith.constant dense<0.000000e+00> : vector<8x64xf32>
    %170 = tpu.matmul %169, %0, %cst_53 {dimension_numbers = #tpu.dot_dimension_numbers<[1], [0], [0], [1], [0, 0, 1, 1], [], []>} : vector<8x32xf32>, vector<32x64xf32>, vector<8x64xf32> -> vector<8x64xf32>
    %171 = arith.addf %170, %4 : vector<8x64xf32>
    %172 = math.tanh %171 : vector<8x64xf32>
    %cst_54 = arith.constant dense<0.000000e+00> : vector<8x32xf32>
    %173 = tpu.matmul %172, %1, %cst_54 {dimension_numbers = #tpu.dot_dimension_numbers<[1], [0], [0], [1], [0, 0, 1, 1], [], []>} : vector<8x64xf32>, vector<64x32xf32>, vector<8x32xf32> -> vector<8x32xf32>
    %174 = arith.addf %173, %7 : vector<8x32xf32>
    %175 = arith.subf %155, %163 : vector<8x32xf32>
    %176 = arith.addf %175, %174 : vector<8x32xf32>
    %177 = vector.broadcast %148 : f32 to vector<8x32xf32>
    %178 = arith.mulf %177, %176 : vector<8x32xf32>
    %179 = arith.addf %146, %178 : vector<8x32xf32>
    %cst_55 = arith.constant dense<0.000000e+00> : vector<8x64xf32>
    %180 = tpu.matmul %179, %0, %cst_55 {dimension_numbers = #tpu.dot_dimension_numbers<[1], [0], [0], [1], [0, 0, 1, 1], [], []>} : vector<8x32xf32>, vector<32x64xf32>, vector<8x64xf32> -> vector<8x64xf32>
    %181 = arith.addf %180, %4 : vector<8x64xf32>
    %182 = math.tanh %181 : vector<8x64xf32>
    %cst_56 = arith.constant dense<0.000000e+00> : vector<8x32xf32>
    %183 = tpu.matmul %182, %1, %cst_56 {dimension_numbers = #tpu.dot_dimension_numbers<[1], [0], [0], [1], [0, 0, 1, 1], [], []>} : vector<8x64xf32>, vector<64x32xf32>, vector<8x32xf32> -> vector<8x32xf32>
    %184 = arith.addf %183, %7 : vector<8x32xf32>
    %185 = arith.addf %163, %174 : vector<8x32xf32>
    %cst_57 = arith.constant 3.000000e+00 : f32
    %186 = vector.broadcast %cst_57 : f32 to vector<8x32xf32>
    %187 = arith.mulf %186, %185 : vector<8x32xf32>
    %188 = arith.addf %155, %187 : vector<8x32xf32>
    %189 = arith.addf %188, %184 : vector<8x32xf32>
    %190 = vector.broadcast %150 : f32 to vector<8x32xf32>
    %191 = arith.mulf %190, %189 : vector<8x32xf32>
    %192 = arith.addf %146, %191 : vector<8x32xf32>
    %c0_58 = arith.constant 0 : index
    %c128 = arith.constant 128 : index
    %193 = vector.load %arg6[%c0_58, %c128] : memref<8x256xf32, #tpu.memory_space<vmem>>, vector<8x32xf32>
    tpu.vector_store %arg6[%c0_58, %c128], %192 {strides = array<i32>} : memref<8x256xf32, #tpu.memory_space<vmem>>, vector<8x32xf32>,
    %c4 = arith.constant 4 : index
    %194 = memref.load %arg0[%c4] : memref<8xf32, #tpu.memory_space<smem>>
    %cst_59 = arith.constant 0.333333343 : f32
    %195 = arith.mulf %194, %cst_59 : f32
    %cst_60 = arith.constant 1.250000e-01 : f32
    %196 = arith.mulf %194, %cst_60 : f32
    %cst_61 = arith.constant dense<0.000000e+00> : vector<8x64xf32>
    %197 = tpu.matmul %192, %0, %cst_61 {dimension_numbers = #tpu.dot_dimension_numbers<[1], [0], [0], [1], [0, 0, 1, 1], [], []>} : vector<8x32xf32>, vector<32x64xf32>, vector<8x64xf32> -> vector<8x64xf32>
    %198 = arith.addf %197, %4 : vector<8x64xf32>
    %199 = math.tanh %198 : vector<8x64xf32>
    %cst_62 = arith.constant dense<0.000000e+00> : vector<8x32xf32>
    %200 = tpu.matmul %199, %1, %cst_62 {dimension_numbers = #tpu.dot_dimension_numbers<[1], [0], [0], [1], [0, 0, 1, 1], [], []>} : vector<8x64xf32>, vector<64x32xf32>, vector<8x32xf32> -> vector<8x32xf32>
    %201 = arith.addf %200, %7 : vector<8x32xf32>
    %202 = vector.broadcast %195 : f32 to vector<8x32xf32>
    %203 = arith.mulf %202, %201 : vector<8x32xf32>
    %204 = arith.addf %192, %203 : vector<8x32xf32>
    %cst_63 = arith.constant dense<0.000000e+00> : vector<8x64xf32>
    %205 = tpu.matmul %204, %0, %cst_63 {dimension_numbers = #tpu.dot_dimension_numbers<[1], [0], [0], [1], [0, 0, 1, 1], [], []>} : vector<8x32xf32>, vector<32x64xf32>, vector<8x64xf32> -> vector<8x64xf32>
    %206 = arith.addf %205, %4 : vector<8x64xf32>
    %207 = math.tanh %206 : vector<8x64xf32>
    %cst_64 = arith.constant dense<0.000000e+00> : vector<8x32xf32>
    %208 = tpu.matmul %207, %1, %cst_64 {dimension_numbers = #tpu.dot_dimension_numbers<[1], [0], [0], [1], [0, 0, 1, 1], [], []>} : vector<8x64xf32>, vector<64x32xf32>, vector<8x32xf32> -> vector<8x32xf32>
    %209 = arith.addf %208, %7 : vector<8x32xf32>
    %210 = vector.broadcast %194 : f32 to vector<8x32xf32>
    %211 = arith.mulf %210, %209 : vector<8x32xf32>
    %212 = arith.addf %192, %211 : vector<8x32xf32>
    %213 = vector.broadcast %195 : f32 to vector<8x32xf32>
    %214 = arith.mulf %213, %201 : vector<8x32xf32>
    %215 = arith.subf %212, %214 : vector<8x32xf32>
    %cst_65 = arith.constant dense<0.000000e+00> : vector<8x64xf32>
    %216 = tpu.matmul %215, %0, %cst_65 {dimension_numbers = #tpu.dot_dimension_numbers<[1], [0], [0], [1], [0, 0, 1, 1], [], []>} : vector<8x32xf32>, vector<32x64xf32>, vector<8x64xf32> -> vector<8x64xf32>
    %217 = arith.addf %216, %4 : vector<8x64xf32>
    %218 = math.tanh %217 : vector<8x64xf32>
    %cst_66 = arith.constant dense<0.000000e+00> : vector<8x32xf32>
    %219 = tpu.matmul %218, %1, %cst_66 {dimension_numbers = #tpu.dot_dimension_numbers<[1], [0], [0], [1], [0, 0, 1, 1], [], []>} : vector<8x64xf32>, vector<64x32xf32>, vector<8x32xf32> -> vector<8x32xf32>
    %220 = arith.addf %219, %7 : vector<8x32xf32>
    %221 = arith.subf %201, %209 : vector<8x32xf32>
    %222 = arith.addf %221, %220 : vector<8x32xf32>
    %223 = vector.broadcast %194 : f32 to vector<8x32xf32>
    %224 = arith.mulf %223, %222 : vector<8x32xf32>
    %225 = arith.addf %192, %224 : vector<8x32xf32>
    %cst_67 = arith.constant dense<0.000000e+00> : vector<8x64xf32>
    %226 = tpu.matmul %225, %0, %cst_67 {dimension_numbers = #tpu.dot_dimension_numbers<[1], [0], [0], [1], [0, 0, 1, 1], [], []>} : vector<8x32xf32>, vector<32x64xf32>, vector<8x64xf32> -> vector<8x64xf32>
    %227 = arith.addf %226, %4 : vector<8x64xf32>
    %228 = math.tanh %227 : vector<8x64xf32>
    %cst_68 = arith.constant dense<0.000000e+00> : vector<8x32xf32>
    %229 = tpu.matmul %228, %1, %cst_68 {dimension_numbers = #tpu.dot_dimension_numbers<[1], [0], [0], [1], [0, 0, 1, 1], [], []>} : vector<8x64xf32>, vector<64x32xf32>, vector<8x32xf32> -> vector<8x32xf32>
    %230 = arith.addf %229, %7 : vector<8x32xf32>
    %231 = arith.addf %209, %220 : vector<8x32xf32>
    %cst_69 = arith.constant 3.000000e+00 : f32
    %232 = vector.broadcast %cst_69 : f32 to vector<8x32xf32>
    %233 = arith.mulf %232, %231 : vector<8x32xf32>
    %234 = arith.addf %201, %233 : vector<8x32xf32>
    %235 = arith.addf %234, %230 : vector<8x32xf32>
    %236 = vector.broadcast %196 : f32 to vector<8x32xf32>
    %237 = arith.mulf %236, %235 : vector<8x32xf32>
    %238 = arith.addf %192, %237 : vector<8x32xf32>
    %c0_70 = arith.constant 0 : index
    %c160 = arith.constant 160 : index
    %239 = vector.load %arg6[%c0_70, %c160] : memref<8x256xf32, #tpu.memory_space<vmem>>, vector<8x32xf32>
    tpu.vector_store %arg6[%c0_70, %c160], %238 {strides = array<i32>} : memref<8x256xf32, #tpu.memory_space<vmem>>, vector<8x32xf32>,
    %c5 = arith.constant 5 : index
    %240 = memref.load %arg0[%c5] : memref<8xf32, #tpu.memory_space<smem>>
    %cst_71 = arith.constant 0.333333343 : f32
    %241 = arith.mulf %240, %cst_71 : f32
    %cst_72 = arith.constant 1.250000e-01 : f32
    %242 = arith.mulf %240, %cst_72 : f32
    %cst_73 = arith.constant dense<0.000000e+00> : vector<8x64xf32>
    %243 = tpu.matmul %238, %0, %cst_73 {dimension_numbers = #tpu.dot_dimension_numbers<[1], [0], [0], [1], [0, 0, 1, 1], [], []>} : vector<8x32xf32>, vector<32x64xf32>, vector<8x64xf32> -> vector<8x64xf32>
    %244 = arith.addf %243, %4 : vector<8x64xf32>
    %245 = math.tanh %244 : vector<8x64xf32>
    %cst_74 = arith.constant dense<0.000000e+00> : vector<8x32xf32>
    %246 = tpu.matmul %245, %1, %cst_74 {dimension_numbers = #tpu.dot_dimension_numbers<[1], [0], [0], [1], [0, 0, 1, 1], [], []>} : vector<8x64xf32>, vector<64x32xf32>, vector<8x32xf32> -> vector<8x32xf32>
    %247 = arith.addf %246, %7 : vector<8x32xf32>
    %248 = vector.broadcast %241 : f32 to vector<8x32xf32>
    %249 = arith.mulf %248, %247 : vector<8x32xf32>
    %250 = arith.addf %238, %249 : vector<8x32xf32>
    %cst_75 = arith.constant dense<0.000000e+00> : vector<8x64xf32>
    %251 = tpu.matmul %250, %0, %cst_75 {dimension_numbers = #tpu.dot_dimension_numbers<[1], [0], [0], [1], [0, 0, 1, 1], [], []>} : vector<8x32xf32>, vector<32x64xf32>, vector<8x64xf32> -> vector<8x64xf32>
    %252 = arith.addf %251, %4 : vector<8x64xf32>
    %253 = math.tanh %252 : vector<8x64xf32>
    %cst_76 = arith.constant dense<0.000000e+00> : vector<8x32xf32>
    %254 = tpu.matmul %253, %1, %cst_76 {dimension_numbers = #tpu.dot_dimension_numbers<[1], [0], [0], [1], [0, 0, 1, 1], [], []>} : vector<8x64xf32>, vector<64x32xf32>, vector<8x32xf32> -> vector<8x32xf32>
    %255 = arith.addf %254, %7 : vector<8x32xf32>
    %256 = vector.broadcast %240 : f32 to vector<8x32xf32>
    %257 = arith.mulf %256, %255 : vector<8x32xf32>
    %258 = arith.addf %238, %257 : vector<8x32xf32>
    %259 = vector.broadcast %241 : f32 to vector<8x32xf32>
    %260 = arith.mulf %259, %247 : vector<8x32xf32>
    %261 = arith.subf %258, %260 : vector<8x32xf32>
    %cst_77 = arith.constant dense<0.000000e+00> : vector<8x64xf32>
    %262 = tpu.matmul %261, %0, %cst_77 {dimension_numbers = #tpu.dot_dimension_numbers<[1], [0], [0], [1], [0, 0, 1, 1], [], []>} : vector<8x32xf32>, vector<32x64xf32>, vector<8x64xf32> -> vector<8x64xf32>
    %263 = arith.addf %262, %4 : vector<8x64xf32>
    %264 = math.tanh %263 : vector<8x64xf32>
    %cst_78 = arith.constant dense<0.000000e+00> : vector<8x32xf32>
    %265 = tpu.matmul %264, %1, %cst_78 {dimension_numbers = #tpu.dot_dimension_numbers<[1], [0], [0], [1], [0, 0, 1, 1], [], []>} : vector<8x64xf32>, vector<64x32xf32>, vector<8x32xf32> -> vector<8x32xf32>
    %266 = arith.addf %265, %7 : vector<8x32xf32>
    %267 = arith.subf %247, %255 : vector<8x32xf32>
    %268 = arith.addf %267, %266 : vector<8x32xf32>
    %269 = vector.broadcast %240 : f32 to vector<8x32xf32>
    %270 = arith.mulf %269, %268 : vector<8x32xf32>
    %271 = arith.addf %238, %270 : vector<8x32xf32>
    %cst_79 = arith.constant dense<0.000000e+00> : vector<8x64xf32>
    %272 = tpu.matmul %271, %0, %cst_79 {dimension_numbers = #tpu.dot_dimension_numbers<[1], [0], [0], [1], [0, 0, 1, 1], [], []>} : vector<8x32xf32>, vector<32x64xf32>, vector<8x64xf32> -> vector<8x64xf32>
    %273 = arith.addf %272, %4 : vector<8x64xf32>
    %274 = math.tanh %273 : vector<8x64xf32>
    %cst_80 = arith.constant dense<0.000000e+00> : vector<8x32xf32>
    %275 = tpu.matmul %274, %1, %cst_80 {dimension_numbers = #tpu.dot_dimension_numbers<[1], [0], [0], [1], [0, 0, 1, 1], [], []>} : vector<8x64xf32>, vector<64x32xf32>, vector<8x32xf32> -> vector<8x32xf32>
    %276 = arith.addf %275, %7 : vector<8x32xf32>
    %277 = arith.addf %255, %266 : vector<8x32xf32>
    %cst_81 = arith.constant 3.000000e+00 : f32
    %278 = vector.broadcast %cst_81 : f32 to vector<8x32xf32>
    %279 = arith.mulf %278, %277 : vector<8x32xf32>
    %280 = arith.addf %247, %279 : vector<8x32xf32>
    %281 = arith.addf %280, %276 : vector<8x32xf32>
    %282 = vector.broadcast %242 : f32 to vector<8x32xf32>
    %283 = arith.mulf %282, %281 : vector<8x32xf32>
    %284 = arith.addf %238, %283 : vector<8x32xf32>
    %c0_82 = arith.constant 0 : index
    %c192 = arith.constant 192 : index
    %285 = vector.load %arg6[%c0_82, %c192] : memref<8x256xf32, #tpu.memory_space<vmem>>, vector<8x32xf32>
    tpu.vector_store %arg6[%c0_82, %c192], %284 {strides = array<i32>} : memref<8x256xf32, #tpu.memory_space<vmem>>, vector<8x32xf32>,
    %c6 = arith.constant 6 : index
    %286 = memref.load %arg0[%c6] : memref<8xf32, #tpu.memory_space<smem>>
    %cst_83 = arith.constant 0.333333343 : f32
    %287 = arith.mulf %286, %cst_83 : f32
    %cst_84 = arith.constant 1.250000e-01 : f32
    %288 = arith.mulf %286, %cst_84 : f32
    %cst_85 = arith.constant dense<0.000000e+00> : vector<8x64xf32>
    %289 = tpu.matmul %284, %0, %cst_85 {dimension_numbers = #tpu.dot_dimension_numbers<[1], [0], [0], [1], [0, 0, 1, 1], [], []>} : vector<8x32xf32>, vector<32x64xf32>, vector<8x64xf32> -> vector<8x64xf32>
    %290 = arith.addf %289, %4 : vector<8x64xf32>
    %291 = math.tanh %290 : vector<8x64xf32>
    %cst_86 = arith.constant dense<0.000000e+00> : vector<8x32xf32>
    %292 = tpu.matmul %291, %1, %cst_86 {dimension_numbers = #tpu.dot_dimension_numbers<[1], [0], [0], [1], [0, 0, 1, 1], [], []>} : vector<8x64xf32>, vector<64x32xf32>, vector<8x32xf32> -> vector<8x32xf32>
    %293 = arith.addf %292, %7 : vector<8x32xf32>
    %294 = vector.broadcast %287 : f32 to vector<8x32xf32>
    %295 = arith.mulf %294, %293 : vector<8x32xf32>
    %296 = arith.addf %284, %295 : vector<8x32xf32>
    %cst_87 = arith.constant dense<0.000000e+00> : vector<8x64xf32>
    %297 = tpu.matmul %296, %0, %cst_87 {dimension_numbers = #tpu.dot_dimension_numbers<[1], [0], [0], [1], [0, 0, 1, 1], [], []>} : vector<8x32xf32>, vector<32x64xf32>, vector<8x64xf32> -> vector<8x64xf32>
    %298 = arith.addf %297, %4 : vector<8x64xf32>
    %299 = math.tanh %298 : vector<8x64xf32>
    %cst_88 = arith.constant dense<0.000000e+00> : vector<8x32xf32>
    %300 = tpu.matmul %299, %1, %cst_88 {dimension_numbers = #tpu.dot_dimension_numbers<[1], [0], [0], [1], [0, 0, 1, 1], [], []>} : vector<8x64xf32>, vector<64x32xf32>, vector<8x32xf32> -> vector<8x32xf32>
    %301 = arith.addf %300, %7 : vector<8x32xf32>
    %302 = vector.broadcast %286 : f32 to vector<8x32xf32>
    %303 = arith.mulf %302, %301 : vector<8x32xf32>
    %304 = arith.addf %284, %303 : vector<8x32xf32>
    %305 = vector.broadcast %287 : f32 to vector<8x32xf32>
    %306 = arith.mulf %305, %293 : vector<8x32xf32>
    %307 = arith.subf %304, %306 : vector<8x32xf32>
    %cst_89 = arith.constant dense<0.000000e+00> : vector<8x64xf32>
    %308 = tpu.matmul %307, %0, %cst_89 {dimension_numbers = #tpu.dot_dimension_numbers<[1], [0], [0], [1], [0, 0, 1, 1], [], []>} : vector<8x32xf32>, vector<32x64xf32>, vector<8x64xf32> -> vector<8x64xf32>
    %309 = arith.addf %308, %4 : vector<8x64xf32>
    %310 = math.tanh %309 : vector<8x64xf32>
    %cst_90 = arith.constant dense<0.000000e+00> : vector<8x32xf32>
    %311 = tpu.matmul %310, %1, %cst_90 {dimension_numbers = #tpu.dot_dimension_numbers<[1], [0], [0], [1], [0, 0, 1, 1], [], []>} : vector<8x64xf32>, vector<64x32xf32>, vector<8x32xf32> -> vector<8x32xf32>
    %312 = arith.addf %311, %7 : vector<8x32xf32>
    %313 = arith.subf %293, %301 : vector<8x32xf32>
    %314 = arith.addf %313, %312 : vector<8x32xf32>
    %315 = vector.broadcast %286 : f32 to vector<8x32xf32>
    %316 = arith.mulf %315, %314 : vector<8x32xf32>
    %317 = arith.addf %284, %316 : vector<8x32xf32>
    %cst_91 = arith.constant dense<0.000000e+00> : vector<8x64xf32>
    %318 = tpu.matmul %317, %0, %cst_91 {dimension_numbers = #tpu.dot_dimension_numbers<[1], [0], [0], [1], [0, 0, 1, 1], [], []>} : vector<8x32xf32>, vector<32x64xf32>, vector<8x64xf32> -> vector<8x64xf32>
    %319 = arith.addf %318, %4 : vector<8x64xf32>
    %320 = math.tanh %319 : vector<8x64xf32>
    %cst_92 = arith.constant dense<0.000000e+00> : vector<8x32xf32>
    %321 = tpu.matmul %320, %1, %cst_92 {dimension_numbers = #tpu.dot_dimension_numbers<[1], [0], [0], [1], [0, 0, 1, 1], [], []>} : vector<8x64xf32>, vector<64x32xf32>, vector<8x32xf32> -> vector<8x32xf32>
    %322 = arith.addf %321, %7 : vector<8x32xf32>
    %323 = arith.addf %301, %312 : vector<8x32xf32>
    %cst_93 = arith.constant 3.000000e+00 : f32
    %324 = vector.broadcast %cst_93 : f32 to vector<8x32xf32>
    %325 = arith.mulf %324, %323 : vector<8x32xf32>
    %326 = arith.addf %293, %325 : vector<8x32xf32>
    %327 = arith.addf %326, %322 : vector<8x32xf32>
    %328 = vector.broadcast %288 : f32 to vector<8x32xf32>
    %329 = arith.mulf %328, %327 : vector<8x32xf32>
    %330 = arith.addf %284, %329 : vector<8x32xf32>
    %c0_94 = arith.constant 0 : index
    %c224 = arith.constant 224 : index
    %331 = vector.load %arg6[%c0_94, %c224] : memref<8x256xf32, #tpu.memory_space<vmem>>, vector<8x32xf32>
    tpu.vector_store %arg6[%c0_94, %c224], %330 {strides = array<i32>} : memref<8x256xf32, #tpu.memory_space<vmem>>, vector<8x32xf32>,
    return
  }
}

</mosaic_0001>

<bundles_post_ra>
// kernel: tpu_custom_call.1
= control target key start
LH: loop header
LB: loop body
LE: loop exit
PB: predicated region body
PF: predicated region fallthrough
CT: control target
= control target key end

     0   :  { %11 = vsyncpa [#allocation4], 0  ;;  %s7107_s0 = inlined_call_operand.vmem [shape: f32[8], index: 0, kind: input, shape index: {}]   ;;  %s7108_s1 = inlined_call_operand.vmem [shape: f32[8,32], index: 1, kind: input, shape index: {}]   ;;  %s7109_s2 = inlined_call_operand.vmem [shape: f32[32,64], index: 2, kind: input, shape index: {}]   ;;  %s7110_s3 = inlined_call_operand.vmem [shape: f32[1,64], index: 3, kind: input, shape index: {}]   ;;  %s7111_s4 = inlined_call_operand.vmem [shape: f32[64,32], index: 4, kind: input, shape index: {}]   ;;  %s7112_s5 = inlined_call_operand.vmem [shape: f32[1,32], index: 5, kind: input, shape index: {}]   ;;  %s7113_s6 = inlined_call_operand.hbm [shape: f32[8,256], index: 6, kind: output, shape index: {}]  }
   0x1   :  { %12 = vsyncpa [#allocation3], 0  ;;  %s19_s23 = sshll.u32 %s7107_s0, 4  ;;  %s20_s23 = int_to_ptr.vmem [resolvable:$true] %s19_s23 }
   0x2   :  { %s6240_s24 = scalar_lea.vmem %s20_s23, 16  ;;  %p6245_p1 = scmp.lt.s32.totalorder %s20_s23, %s20_s23 }
   0x3   :  { %p6241_p0 = scmp.ne.s32.totalorder %s20_s23, %s6240_s24  ;;  %p6246_p2 = scmp.lt.s32.totalorder %s6240_s24, %s6240_s24 }
   0x5   :  { %p6247_p3 = por %p6246_p2, %p6245_p1 }
   0x7   :  { %p6248_p4 = pnand %p6247_p3, %p6241_p0 }
   0x9   :  { %6251 = shalt.err (!%p6248_p4)
}
   0xa   :  { %s6278_s25 = smov [#allocation2]  }
   0xb   :  { %22 = dma.vmem_to_smem %s20_s23, 16, %s6278_s25, [#allocation4]  }
   0xc   :  { %6274 = dma.done.wait [#allocation4], 16  }
   0xd   :  { %6275 = vsyncadd [#allocation4], 4294967280 }
   0xe   :  { %36 = sfence }
   0xf   :  { %v37_v0 = vld [vmem:[%s7109_s2] sm:$0xff]  ;;  %v38_v1 = vld [vmem:[%s7109_s2 + $0x8] sm:$0xff]  ;;  %v39_v2 = vld [vmem:[%s7109_s2 + $0x10] sm:$0xff]  ;;  %v6279_v3 = vmov 0.0|0.0   ;;  %vm6280_vm0 = vmmov 0   ;;  %v6281_v6 = vmov 0.0  }
  0x10   :  { %5670 = vmatprep.subr.bf16.mxu1 %v6279_v3  ;;  %v6334_v4 = vpack.c.bf16 %v38_v1, %v37_v0  ;;  %v40_v5 = vld [vmem:[%s7109_s2 + $0x18] sm:$0xff]  ;;  %4838 = vmatprep.mubr.msk.f32.mxu1 %vm6280_vm0, %v6281_v6  ;;  %v6344_v7 = vld [vmem:[%s7108_s1] sm:$0xff]  ;;  %vm64_vm1 = vcmask 261120   ;;  %v42_v10 = vld [vmem:[%s7111_s4 + $0x8] sm:$0xff]  ;;  %vm143_vm2 = vcmask 523264   ;;  %s6282_s30 = smov 32  }
  0x11   :  { %65 = vst.msk [vmem:[#allocation5] sm:$0xff] %vm64_vm1, %v6344_v7  ;;  %5688 = vmatprep.subr.bf16.mxu0 %v6279_v3  ;;  %4868 = vmatprep.mubr.msk.f32.mxu0 %vm6280_vm0, %v6281_v6  ;;  %v6352_v8 = vpack.c.bf16 %v40_v5, %v39_v2  ;;  %v41_v9 = vld [vmem:[%s7111_s4] sm:$0xff]  ;;  %v43_v12 = vld [vmem:[%s7111_s4 + $0x10] sm:$0xff]  ;;  %v44_v13 = vld [vmem:[%s7111_s4 + $0x18] sm:$0xff]  ;;  %vm680_vm3 = vcmask 523520   ;;  %s6523_s7 = sld [smem:[#allocation2 + $0x1]] }
  0x12   :  { %5672 = vmatpush3.bf16.msra.mxu1 %v6334_v4  ;;  %5690 = vmatpush3.bf16.msra.mxu0 %v6334_v4  ;;  %v6364_v11 = vpack.c.bf16 %v42_v10, %v41_v9  ;;  %v6381_v14 = vpack.c.bf16 %v44_v13, %v43_v12  ;;  %v45_v15 = vld [vmem:[%s7111_s4 + $0x20] sm:$0xff]  ;;  %v46_v16 = vld [vmem:[%s7111_s4 + $0x28] sm:$0xff]  ;;  %v47_v18 = vld [vmem:[%s7111_s4 + $0x30] sm:$0xff]  ;;  %s6283_s10 = smov 64   ;;  %vm1294_vm4 = vcmask 785920   ;;  %s6623_s2 = sld [smem:[#allocation2 + $0x2]] }
  0x13   :  { %5673 = vmatprep.subr.bf16.mxu1 %v6279_v3  ;;  %5691 = vmatprep.subr.bf16.mxu0 %v6279_v3  ;;  %v6391_v17 = vpack.c.bf16 %v46_v16, %v45_v15  ;;  %v48_v19 = vld [vmem:[%s7111_s4 + $0x38] sm:$0xff]  ;;  %v6408_v21 = vld [vmem:[%s7110_s3] ss:$0 sm:$0xff]  ;;  %s6418_s4 = sld [smem:[#allocation2]]  ;;  %s6720_s12 = sld [smem:[#allocation2 + $0x3]]  ;;  %vm1908_vm5 = vcmask 1048320  }
  0x14   :  { %v6400_v20 = vpack.c.bf16 %v48_v19, %v47_v18  ;;  %v6424_v26 = vld [vmem:[%s7112_s5] ss:$0 sm:$0xff]  ;;  %s6819_s15 = sld [smem:[#allocation2 + $0x4]]  ;;  %s6284_s20 = smov 96  }
  0x15   :  { %s6932_s21 = sld [smem:[#allocation2 + $0x5]]  ;;  %s7032_s24 = sld [smem:[#allocation2 + $0x6]] }
  0x16   :  { %5675 = vmatpush3.bf16.msra.mxu1 %v6352_v8  ;;  %5693 = vmatpush3.bf16.msra.mxu0 %v6352_v8 }
  0x17   :  { %5676 = vmatprep.subr.bf16.mxu1 %v6279_v3  ;;  %5694 = vmatprep.subr.bf16.mxu0 %v6279_v3  ;;  %s683_s8 = smul.f32 0.33333334, %s6523_s7 }
  0x18   :  { %s684_s9 = smul.f32 0.125, %s6523_s7 }
  0x19   :  { %4839 = vmatmul.mubr.msk.f32.vlgmr.msra.gmra.mrb[0].mxu1 %vm64_vm1, %v6344_v7  ;;  %s67_s27 = smul.f32 0.33333334, %s6418_s4  ;;  %v367_v38 = vstv %s6418_s4  ;;  %v831_v18 = vstv %s683_s8 }
  0x1a   :  { %5678 = vmatpush3.bf16.msra.mxu1 %v6364_v11  ;;  %4857 = vmatprep.mubr.msk.f32.mxu1 %vm6280_vm0, %v6281_v6  ;;  %s68_s0 = smul.f32 0.125, %s6418_s4  ;;  %s6285_s4 = smov [#allocation5]  }
  0x1b   :  { %5679 = vmatprep.subr.bf16.mxu1 %v6279_v3  ;;  %v217_v28 = vstv %s67_s27  ;;  %s1297_s1 = smul.f32 0.33333334, %s6623_s2  ;;  %s4365_s27 = sshll.u32 %s6285_s4, 4  ;;  %s4366_s27 = int_to_ptr.vmem [resolvable:$true] %s4365_s27 }
  0x1c   :  { %v673_v1 = vstv %s68_s0  ;;  %s1298_s11 = smul.f32 0.125, %s6623_s2  ;;  %s6252_s28 = scalar_lea.vmem %s4366_s27, 256 }
  0x1d   :  { %s1911_s13 = smul.f32 0.33333334, %s6720_s12  ;;  %p6253_p5 = scmp.ne.s32.totalorder %s4366_s27, %s6252_s28 }
  0x1e   :  { %5681 = vmatpush3.bf16.msra.mxu1 %v6381_v14  ;;  %s1912_s14 = smul.f32 0.125, %s6720_s12  ;;  %p6257_p6 = scmp.lt.s32.totalorder %s4366_s27, %s4366_s27 }
  0x1f   :  { %5682 = vmatprep.subr.bf16.mxu1 %v6279_v3  ;;  %s2520_s16 = smul.f32 0.33333334, %s6819_s15  ;;  %p6258_p7 = scmp.lt.s32.totalorder %s6252_s28, %s6252_s28 }
  0x20   :  { %s3134_s22 = smul.f32 0.33333334, %s6932_s21 }
  0x21   :  { %s3135_s23 = smul.f32 0.125, %s6932_s21  ;;  %p6259_p8 = por %p6258_p7, %p6257_p6 }
  0x22   :  { %5684 = vmatpush3.bf16.msra.mxu1 %v6391_v17  ;;  %s3747_s25 = smul.f32 0.33333334, %s7032_s24 }
  0x23   :  { %5685 = vmatprep.subr.bf16.mxu1 %v6279_v3  ;;  %s3748_s26 = smul.f32 0.125, %s7032_s24  ;;  %p6260_p9 = pnand %p6259_p8, %p6253_p5 }
  0x26   :  { %5687 = vmatpush3.bf16.msra.mxu1 %v6400_v20 }
  0x27   :  { %5706 = vmatprep.subr.bf16.mxu1 %v6279_v3 }
  0xec   :  { %v138_v22 = vpop.f32.mrb[0].mxu1 }
  0xed   :  { %v139_v23 = vadd.f32 %v6408_v21, %v138_v22  ;;  %v4840_v24 = vpop.f32.mrb[1].mxu1 }
  0xef   :  { %6182 = vtanh.f32 %v139_v23 }
  0xf9   :  { %v6183_v25 = vpop.eup %6182 }
  0xfa   :  { %4858 = vmatmul.mubr.msk.f32.vlgmr.msra.gmra.mrb[2].mxu1 %vm143_vm2, %v6183_v25 }
  0xfb   :  { %5708 = vmatpush3.bf16.msra.mxu1 %v6334_v4  ;;  %4898 = vmatprep.mubr.msk.f32.mxu1 %vm6280_vm0, %v6281_v6 }
  0xfc   :  { %5709 = vmatprep.subr.bf16.mxu1 %v6279_v3 }
  0xff   :  { %5711 = vmatpush3.bf16.msra.mxu1 %v6352_v8 }
 0x100   :  { %5712 = vmatprep.subr.bf16.mxu1 %v6279_v3 }
 0x1cd   :  { %v213_v27 = vpop.f32.mrb[2].mxu1 }
 0x1ce   :  { %v6427_v29 = vadd.f32 %v6424_v26, %v213_v27  ;;  %v4859_v30 = vpop.f32.mrb[3].mxu1 }
 0x1d0   :  { %v218_v31 = vmul.f32 %v217_v28, %v6427_v29 }
 0x1d2   :  { %v219_v32 = vadd.f32 %v218_v31, %v6344_v7 }
 0x1d4   :  { %4869 = vmatmul.mubr.msk.f32.vlgmr.msra.gmra.mrb[0].mxu0 %vm64_vm1, %v219_v32 }
 0x1d5   :  { %5696 = vmatpush3.bf16.msra.mxu0 %v6364_v11  ;;  %4887 = vmatprep.mubr.msk.f32.mxu0 %vm6280_vm0, %v6281_v6 }
 0x1d6   :  { %5697 = vmatprep.subr.bf16.mxu0 %v6279_v3 }
 0x1d9   :  { %5699 = vmatpush3.bf16.msra.mxu0 %v6381_v14 }
 0x1da   :  { %5700 = vmatprep.subr.bf16.mxu0 %v6279_v3 }
 0x1dd   :  { %5702 = vmatpush3.bf16.msra.mxu0 %v6391_v17 }
 0x1de   :  { %5703 = vmatprep.subr.bf16.mxu0 %v6279_v3 }
 0x1e1   :  { %5705 = vmatpush3.bf16.msra.mxu0 %v6400_v20 }
 0x1e2   :  { %5724 = vmatprep.subr.bf16.mxu0 %v6279_v3 }
 0x2a7   :  { %v289_v33 = vpop.f32.mrb[0].mxu0 }
 0x2a8   :  { %v290_v34 = vadd.f32 %v6408_v21, %v289_v33  ;;  %v4870_v35 = vpop.f32.mrb[1].mxu0 }
 0x2aa   :  { %6184 = vtanh.f32 %v290_v34 }
 0x2b4   :  { %v6185_v36 = vpop.eup %6184 }
 0x2b5   :  { %4888 = vmatmul.mubr.msk.f32.vlgmr.msra.gmra.mrb[2].mxu0 %vm143_vm2, %v6185_v36 }
 0x2b6   :  { %5726 = vmatpush3.bf16.msra.mxu0 %v6334_v4  ;;  %4928 = vmatprep.mubr.msk.f32.mxu0 %vm6280_vm0, %v6281_v6 }
 0x2b7   :  { %5727 = vmatprep.subr.bf16.mxu0 %v6279_v3 }
 0x2ba   :  { %5729 = vmatpush3.bf16.msra.mxu0 %v6352_v8 }
 0x2bb   :  { %5730 = vmatprep.subr.bf16.mxu0 %v6279_v3 }
 0x388   :  { %v363_v37 = vpop.f32.mrb[2].mxu0 }
 0x389   :  { %v364_v39 = vadd.f32 %v6424_v26, %v363_v37  ;;  %v4889_v40 = vpop.f32.mrb[3].mxu0 }
 0x38b   :  { %v368_v41 = vmul.f32 %v367_v38, %v364_v39  ;;  %v518_v50 = vsub.f32 %v6427_v29, %v364_v39 }
 0x38d   :  { %v369_v42 = vadd.f32 %v368_v41, %v6344_v7 }
 0x38f   :  { %v370_v43 = vsub.f32 %v369_v42, %v218_v31  ;;  %v981_v31 = vstv %s6523_s7 }
 0x391   :  { %4899 = vmatmul.mubr.msk.f32.vlgmr.msra.gmra.mrb[4].mxu1 %vm64_vm1, %v370_v43 }
 0x392   :  { %5714 = vmatpush3.bf16.msra.mxu1 %v6364_v11  ;;  %4917 = vmatprep.mubr.msk.f32.mxu1 %vm6280_vm0, %v6281_v6 }
 0x393   :  { %5715 = vmatprep.subr.bf16.mxu1 %v6279_v3 }
 0x396   :  { %5717 = vmatpush3.bf16.msra.mxu1 %v6381_v14 }
 0x397   :  { %5718 = vmatprep.subr.bf16.mxu1 %v6279_v3 }
 0x39a   :  { %5720 = vmatpush3.bf16.msra.mxu1 %v6391_v17 }
 0x39b   :  { %5721 = vmatprep.subr.bf16.mxu1 %v6279_v3 }
 0x39e   :  { %5723 = vmatpush3.bf16.msra.mxu1 %v6400_v20 }
 0x39f   :  { %5742 = vmatprep.subr.bf16.mxu1 %v6279_v3 }
 0x464   :  { %v440_v44 = vpop.f32.mrb[4].mxu1 }
 0x465   :  { %v441_v45 = vadd.f32 %v6408_v21, %v440_v44  ;;  %v4900_v46 = vpop.f32.mrb[5].mxu1 }
 0x467   :  { %6186 = vtanh.f32 %v441_v45 }
 0x471   :  { %v6187_v47 = vpop.eup %6186 }
 0x472   :  { %4918 = vmatmul.mubr.msk.f32.vlgmr.msra.gmra.mrb[6].mxu1 %vm143_vm2, %v6187_v47 }
 0x473   :  { %5744 = vmatpush3.bf16.msra.mxu1 %v6334_v4  ;;  %4958 = vmatprep.mubr.msk.f32.mxu1 %vm6280_vm0, %v6281_v6 }
 0x474   :  { %5745 = vmatprep.subr.bf16.mxu1 %v6279_v3 }
 0x477   :  { %5747 = vmatpush3.bf16.msra.mxu1 %v6352_v8 }
 0x478   :  { %5748 = vmatprep.subr.bf16.mxu1 %v6279_v3 }
 0x545   :  { %v514_v48 = vpop.f32.mrb[6].mxu1 }
 0x546   :  { %v515_v49 = vadd.f32 %v6424_v26, %v514_v48  ;;  %v4919_v51 = vpop.f32.mrb[7].mxu1 }
 0x548   :  { %v519_v52 = vadd.f32 %v518_v50, %v515_v49  ;;  %v669_v59 = vadd.f32 %v515_v49, %v364_v39 }
 0x54a   :  { %v520_v53 = vmul.f32 %v519_v52, %v367_v38  ;;  %v670_v60 = vmul.f32 3.0, %v669_v59 }
 0x54c   :  { %v521_v54 = vadd.f32 %v520_v53, %v6344_v7  ;;  %v671_v63 = vadd.f32 %v670_v60, %v6427_v29 }
 0x54e   :  { %4929 = vmatmul.mubr.msk.f32.vlgmr.msra.gmra.mrb[4].mxu0 %vm64_vm1, %v521_v54 }
 0x54f   :  { %5732 = vmatpush3.bf16.msra.mxu0 %v6364_v11  ;;  %4947 = vmatprep.mubr.msk.f32.mxu0 %vm6280_vm0, %v6281_v6 }
 0x550   :  { %5733 = vmatprep.subr.bf16.mxu0 %v6279_v3 }
 0x553   :  { %5735 = vmatpush3.bf16.msra.mxu0 %v6381_v14 }
 0x554   :  { %5736 = vmatprep.subr.bf16.mxu0 %v6279_v3 }
 0x557   :  { %5738 = vmatpush3.bf16.msra.mxu0 %v6391_v17 }
 0x558   :  { %5739 = vmatprep.subr.bf16.mxu0 %v6279_v3 }
 0x55b   :  { %5741 = vmatpush3.bf16.msra.mxu0 %v6400_v20 }
 0x55c   :  { %5760 = vmatprep.subr.bf16.mxu0 %v6279_v3 }
 0x621   :  { %v591_v55 = vpop.f32.mrb[4].mxu0 }
 0x622   :  { %v592_v56 = vadd.f32 %v6408_v21, %v591_v55  ;;  %v4930_v57 = vpop.f32.mrb[5].mxu0 }
 0x624   :  { %6188 = vtanh.f32 %v592_v56 }
 0x62e   :  { %v6189_v58 = vpop.eup %6188 }
 0x62f   :  { %4948 = vmatmul.mubr.msk.f32.vlgmr.msra.gmra.mrb[6].mxu0 %vm143_vm2, %v6189_v58  ;;  %v1287_v58 = vstv %s684_s9 }
 0x630   :  { %5762 = vmatpush3.bf16.msra.mxu0 %v6334_v4  ;;  %4988 = vmatprep.mubr.msk.f32.mxu0 %vm6280_vm0, %v6281_v6 }
 0x631   :  { %5763 = vmatprep.subr.bf16.mxu0 %v6279_v3 }
 0x634   :  { %5765 = vmatpush3.bf16.msra.mxu0 %v6352_v8 }
 0x635   :  { %5766 = vmatprep.subr.bf16.mxu0 %v6279_v3 }
 0x702   :  { %v665_v61 = vpop.f32.mrb[6].mxu0 }
 0x703   :  { %v666_v62 = vadd.f32 %v6424_v26, %v665_v61  ;;  %v4949_v0 = vpop.f32.mrb[7].mxu0 }
 0x705   :  { %v672_v2 = vadd.f32 %v671_v63, %v666_v62 }
 0x707   :  { %v674_v5 = vmul.f32 %v673_v1, %v672_v2 }
 0x709   :  { %v6498_v9 = vadd.f32 %v674_v5, %v6344_v7 }
 0x70b   :  { %677 = vrot.lane.b32.xlu0 %v6498_v9, %s6282_s30  ;;  %4959 = vmatmul.mubr.msk.f32.vlgmr.msra.gmra.mrb[8].mxu1 %vm64_vm1, %v6498_v9 }
 0x70c   :  { %5750 = vmatpush3.bf16.msra.mxu1 %v6364_v11  ;;  %4977 = vmatprep.mubr.msk.f32.mxu1 %vm6280_vm0, %v6281_v6 }
 0x70d   :  { %5751 = vmatprep.subr.bf16.mxu1 %v6279_v3 }
 0x710   :  { %5753 = vmatpush3.bf16.msra.mxu1 %v6381_v14 }
 0x711   :  { %5754 = vmatprep.subr.bf16.mxu1 %v6279_v3 }
 0x714   :  { %5756 = vmatpush3.bf16.msra.mxu1 %v6391_v17 }
 0x715   :  { %5757 = vmatprep.subr.bf16.mxu1 %v6279_v3 }
 0x718   :  { %5759 = vmatpush3.bf16.msra.mxu1 %v6400_v20 }
 0x719   :  { %5778 = vmatprep.subr.bf16.mxu1 %v6279_v3 }
 0x77d   :  { %v678_v7 = vpop.permute.xlu0 %677 }
 0x77e   :  { %681 = vst.msk [vmem:[#allocation5] sm:$0xff] %vm680_vm3, %v678_v7 }
 0x7de   :  { %v753_v10 = vpop.f32.mrb[8].mxu1 }
 0x7df   :  { %v754_v12 = vadd.f32 %v6408_v21, %v753_v10  ;;  %v4960_v13 = vpop.f32.mrb[9].mxu1 }
 0x7e1   :  { %6190 = vtanh.f32 %v754_v12 }
 0x7eb   :  { %v6191_v15 = vpop.eup %6190 }
 0x7ec   :  { %4978 = vmatmul.mubr.msk.f32.vlgmr.msra.gmra.mrb[10].mxu1 %vm143_vm2, %v6191_v15 }
 0x7ed   :  { %5780 = vmatpush3.bf16.msra.mxu1 %v6334_v4  ;;  %5018 = vmatprep.mubr.msk.f32.mxu1 %vm6280_vm0, %v6281_v6 }
 0x7ee   :  { %5781 = vmatprep.subr.bf16.mxu1 %v6279_v3 }
 0x7f1   :  { %5783 = vmatpush3.bf16.msra.mxu1 %v6352_v8 }
 0x7f2   :  { %5784 = vmatprep.subr.bf16.mxu1 %v6279_v3 }
 0x8bf   :  { %v827_v16 = vpop.f32.mrb[10].mxu1 }
 0x8c0   :  { %v6527_v19 = vadd.f32 %v6424_v26, %v827_v16  ;;  %v4979_v22 = vpop.f32.mrb[11].mxu1 }
 0x8c2   :  { %v832_v23 = vmul.f32 %v831_v18, %v6527_v19 }
 0x8c4   :  { %v833_v24 = vadd.f32 %v832_v23, %v6498_v9 }
 0x8c6   :  { %4989 = vmatmul.mubr.msk.f32.vlgmr.msra.gmra.mrb[8].mxu0 %vm64_vm1, %v833_v24 }
 0x8c7   :  { %5768 = vmatpush3.bf16.msra.mxu0 %v6364_v11  ;;  %5007 = vmatprep.mubr.msk.f32.mxu0 %vm6280_vm0, %v6281_v6 }
 0x8c8   :  { %5769 = vmatprep.subr.bf16.mxu0 %v6279_v3 }
 0x8cb   :  { %5771 = vmatpush3.bf16.msra.mxu0 %v6381_v14 }
 0x8cc   :  { %5772 = vmatprep.subr.bf16.mxu0 %v6279_v3 }
 0x8cf   :  { %5774 = vmatpush3.bf16.msra.mxu0 %v6391_v17 }
 0x8d0   :  { %5775 = vmatprep.subr.bf16.mxu0 %v6279_v3 }
 0x8d3   :  { %5777 = vmatpush3.bf16.msra.mxu0 %v6400_v20 }
 0x8d4   :  { %5796 = vmatprep.subr.bf16.mxu0 %v6279_v3 }
 0x999   :  { %v903_v25 = vpop.f32.mrb[8].mxu0 }
 0x99a   :  { %v904_v27 = vadd.f32 %v6408_v21, %v903_v25  ;;  %v4990_v28 = vpop.f32.mrb[9].mxu0 }
 0x99c   :  { %6192 = vtanh.f32 %v904_v27 }
 0x9a6   :  { %v6193_v29 = vpop.eup %6192 }
 0x9a7   :  { %5008 = vmatmul.mubr.msk.f32.vlgmr.msra.gmra.mrb[10].mxu0 %vm143_vm2, %v6193_v29 }
 0x9a8   :  { %5798 = vmatpush3.bf16.msra.mxu0 %v6334_v4  ;;  %5048 = vmatprep.mubr.msk.f32.mxu0 %vm6280_vm0, %v6281_v6 }
 0x9a9   :  { %5799 = vmatprep.subr.bf16.mxu0 %v6279_v3 }
 0x9ac   :  { %5801 = vmatpush3.bf16.msra.mxu0 %v6352_v8 }
 0x9ad   :  { %5802 = vmatprep.subr.bf16.mxu0 %v6279_v3 }
 0xa7a   :  { %v977_v30 = vpop.f32.mrb[10].mxu0 }
 0xa7b   :  { %v978_v32 = vadd.f32 %v6424_v26, %v977_v30  ;;  %v5009_v33 = vpop.f32.mrb[11].mxu0 }
 0xa7d   :  { %v982_v34 = vmul.f32 %v981_v31, %v978_v32  ;;  %v1132_v43 = vsub.f32 %v6527_v19, %v978_v32 }
 0xa7f   :  { %v983_v35 = vadd.f32 %v982_v34, %v6498_v9 }
 0xa81   :  { %v984_v36 = vsub.f32 %v983_v35, %v832_v23  ;;  %v1595_v23 = vstv %s6623_s2 }
 0xa83   :  { %5019 = vmatmul.mubr.msk.f32.vlgmr.msra.gmra.mrb[12].mxu1 %vm64_vm1, %v984_v36 }
 0xa84   :  { %5786 = vmatpush3.bf16.msra.mxu1 %v6364_v11  ;;  %5037 = vmatprep.mubr.msk.f32.mxu1 %vm6280_vm0, %v6281_v6 }
 0xa85   :  { %5787 = vmatprep.subr.bf16.mxu1 %v6279_v3 }
 0xa88   :  { %5789 = vmatpush3.bf16.msra.mxu1 %v6381_v14 }
 0xa89   :  { %5790 = vmatprep.subr.bf16.mxu1 %v6279_v3 }
 0xa8c   :  { %5792 = vmatpush3.bf16.msra.mxu1 %v6391_v17 }
 0xa8d   :  { %5793 = vmatprep.subr.bf16.mxu1 %v6279_v3 }
 0xa90   :  { %5795 = vmatpush3.bf16.msra.mxu1 %v6400_v20 }
 0xa91   :  { %5814 = vmatprep.subr.bf16.mxu1 %v6279_v3 }
 0xb56   :  { %v1054_v37 = vpop.f32.mrb[12].mxu1 }
 0xb57   :  { %v1055_v38 = vadd.f32 %v6408_v21, %v1054_v37  ;;  %v5020_v39 = vpop.f32.mrb[13].mxu1 }
 0xb59   :  { %6194 = vtanh.f32 %v1055_v38 }
 0xb63   :  { %v6195_v40 = vpop.eup %6194 }
 0xb64   :  { %5038 = vmatmul.mubr.msk.f32.vlgmr.msra.gmra.mrb[14].mxu1 %vm143_vm2, %v6195_v40 }
 0xb65   :  { %5816 = vmatpush3.bf16.msra.mxu1 %v6334_v4  ;;  %5078 = vmatprep.mubr.msk.f32.mxu1 %vm6280_vm0, %v6281_v6 }
 0xb66   :  { %5817 = vmatprep.subr.bf16.mxu1 %v6279_v3 }
 0xb69   :  { %5819 = vmatpush3.bf16.msra.mxu1 %v6352_v8 }
 0xb6a   :  { %5820 = vmatprep.subr.bf16.mxu1 %v6279_v3 }
 0xc37   :  { %v1128_v41 = vpop.f32.mrb[14].mxu1 }
 0xc38   :  { %v1129_v42 = vadd.f32 %v6424_v26, %v1128_v41  ;;  %v5039_v44 = vpop.f32.mrb[15].mxu1 }
 0xc3a   :  { %v1133_v45 = vadd.f32 %v1132_v43, %v1129_v42  ;;  %v1283_v52 = vadd.f32 %v1129_v42, %v978_v32 }
 0xc3c   :  { %v1134_v46 = vmul.f32 %v1133_v45, %v981_v31  ;;  %v1284_v53 = vmul.f32 3.0, %v1283_v52 }
 0xc3e   :  { %v1135_v47 = vadd.f32 %v1134_v46, %v6498_v9  ;;  %v1285_v56 = vadd.f32 %v1284_v53, %v6527_v19 }
 0xc40   :  { %5049 = vmatmul.mubr.msk.f32.vlgmr.msra.gmra.mrb[12].mxu0 %vm64_vm1, %v1135_v47 }
 0xc41   :  { %5804 = vmatpush3.bf16.msra.mxu0 %v6364_v11  ;;  %5067 = vmatprep.mubr.msk.f32.mxu0 %vm6280_vm0, %v6281_v6 }
 0xc42   :  { %5805 = vmatprep.subr.bf16.mxu0 %v6279_v3 }
 0xc45   :  { %5807 = vmatpush3.bf16.msra.mxu0 %v6381_v14 }
 0xc46   :  { %5808 = vmatprep.subr.bf16.mxu0 %v6279_v3 }
 0xc49   :  { %5810 = vmatpush3.bf16.msra.mxu0 %v6391_v17 }
 0xc4a   :  { %5811 = vmatprep.subr.bf16.mxu0 %v6279_v3 }
 0xc4d   :  { %5813 = vmatpush3.bf16.msra.mxu0 %v6400_v20 }
 0xc4e   :  { %5832 = vmatprep.subr.bf16.mxu0 %v6279_v3 }
 0xd13   :  { %v1205_v48 = vpop.f32.mrb[12].mxu0 }
 0xd14   :  { %v1206_v49 = vadd.f32 %v6408_v21, %v1205_v48  ;;  %v5050_v50 = vpop.f32.mrb[13].mxu0 }
 0xd16   :  { %6196 = vtanh.f32 %v1206_v49 }
 0xd20   :  { %v6197_v51 = vpop.eup %6196 }
 0xd21   :  { %5068 = vmatmul.mubr.msk.f32.vlgmr.msra.gmra.mrb[14].mxu0 %vm143_vm2, %v6197_v51  ;;  %v1901_v51 = vstv %s1298_s11 }
 0xd22   :  { %5834 = vmatpush3.bf16.msra.mxu0 %v6334_v4  ;;  %5108 = vmatprep.mubr.msk.f32.mxu0 %vm6280_vm0, %v6281_v6 }
 0xd23   :  { %5835 = vmatprep.subr.bf16.mxu0 %v6279_v3 }
 0xd26   :  { %5837 = vmatpush3.bf16.msra.mxu0 %v6352_v8 }
 0xd27   :  { %5838 = vmatprep.subr.bf16.mxu0 %v6279_v3 }
 0xdf4   :  { %v1279_v54 = vpop.f32.mrb[14].mxu0 }
 0xdf5   :  { %v1280_v55 = vadd.f32 %v6424_v26, %v1279_v54  ;;  %v5069_v57 = vpop.f32.mrb[15].mxu0 }
 0xdf7   :  { %v1286_v59 = vadd.f32 %v1285_v56, %v1280_v55 }
 0xdf9   :  { %v1288_v60 = vmul.f32 %v1287_v58, %v1286_v59 }
 0xdfb   :  { %v6598_v61 = vadd.f32 %v1288_v60, %v6498_v9  ;;  %v1445_v9 = vstv %s1297_s1  ;;  %v2059_v60 = vstv %s1911_s13 }
 0xdfd   :  { %1291 = vrot.lane.b32.xlu1 %v6598_v61, %s6283_s10  ;;  %5079 = vmatmul.mubr.msk.f32.vlgmr.msra.gmra.mrb[16].mxu1 %vm64_vm1, %v6598_v61 }
 0xdfe   :  { %5822 = vmatpush3.bf16.msra.mxu1 %v6364_v11  ;;  %5097 = vmatprep.mubr.msk.f32.mxu1 %vm6280_vm0, %v6281_v6 }
 0xdff   :  { %5823 = vmatprep.subr.bf16.mxu1 %v6279_v3 }
 0xe02   :  { %5825 = vmatpush3.bf16.msra.mxu1 %v6381_v14 }
 0xe03   :  { %5826 = vmatprep.subr.bf16.mxu1 %v6279_v3 }
 0xe06   :  { %5828 = vmatpush3.bf16.msra.mxu1 %v6391_v17 }
 0xe07   :  { %5829 = vmatprep.subr.bf16.mxu1 %v6279_v3 }
 0xe0a   :  { %5831 = vmatpush3.bf16.msra.mxu1 %v6400_v20 }
 0xe0b   :  { %5850 = vmatprep.subr.bf16.mxu1 %v6279_v3 }
 0xe6f   :  { %v1292_v62 = vpop.permute.xlu1 %1291 }
 0xe70   :  { %1295 = vst.msk [vmem:[#allocation5] sm:$0xff] %vm1294_vm4, %v1292_v62 }
 0xed0   :  { %v1367_v63 = vpop.f32.mrb[16].mxu1 }
 0xed1   :  { %v1368_v0 = vadd.f32 %v6408_v21, %v1367_v63  ;;  %v5080_v1 = vpop.f32.mrb[17].mxu1 }
 0xed3   :  { %6198 = vtanh.f32 %v1368_v0 }
 0xedd   :  { %v6199_v2 = vpop.eup %6198 }
 0xede   :  { %5098 = vmatmul.mubr.msk.f32.vlgmr.msra.gmra.mrb[18].mxu1 %vm143_vm2, %v6199_v2 }
 0xedf   :  { %5852 = vmatpush3.bf16.msra.mxu1 %v6334_v4  ;;  %5138 = vmatprep.mubr.msk.f32.mxu1 %vm6280_vm0, %v6281_v6 }
 0xee0   :  { %5853 = vmatprep.subr.bf16.mxu1 %v6279_v3 }
 0xee3   :  { %5855 = vmatpush3.bf16.msra.mxu1 %v6352_v8 }
 0xee4   :  { %5856 = vmatprep.subr.bf16.mxu1 %v6279_v3 }
 0xfb1   :  { %v1441_v5 = vpop.f32.mrb[18].mxu1 }
 0xfb2   :  { %v6627_v7 = vadd.f32 %v6424_v26, %v1441_v5  ;;  %v5099_v10 = vpop.f32.mrb[19].mxu1 }
 0xfb3   :  { %v2209_v10 = vstv %s6720_s12 }
 0xfb4   :  { %v1446_v12 = vmul.f32 %v1445_v9, %v6627_v7 }
 0xfb6   :  { %v1447_v13 = vadd.f32 %v1446_v12, %v6598_v61 }
 0xfb8   :  { %5109 = vmatmul.mubr.msk.f32.vlgmr.msra.gmra.mrb[16].mxu0 %vm64_vm1, %v1447_v13 }
 0xfb9   :  { %5840 = vmatpush3.bf16.msra.mxu0 %v6364_v11  ;;  %5127 = vmatprep.mubr.msk.f32.mxu0 %vm6280_vm0, %v6281_v6 }
 0xfba   :  { %5841 = vmatprep.subr.bf16.mxu0 %v6279_v3 }
 0xfbd   :  { %5843 = vmatpush3.bf16.msra.mxu0 %v6381_v14 }
 0xfbe   :  { %5844 = vmatprep.subr.bf16.mxu0 %v6279_v3 }
 0xfc1   :  { %5846 = vmatpush3.bf16.msra.mxu0 %v6391_v17 }
 0xfc2   :  { %5847 = vmatprep.subr.bf16.mxu0 %v6279_v3 }
 0xfc5   :  { %5849 = vmatpush3.bf16.msra.mxu0 %v6400_v20 }
 0xfc6   :  { %5868 = vmatprep.subr.bf16.mxu0 %v6279_v3 }
0x108b   :  { %v1517_v15 = vpop.f32.mrb[16].mxu0 }
0x108c   :  { %v1518_v16 = vadd.f32 %v6408_v21, %v1517_v15  ;;  %v5110_v18 = vpop.f32.mrb[17].mxu0 }
0x108e   :  { %6200 = vtanh.f32 %v1518_v16 }
0x1098   :  { %v6201_v19 = vpop.eup %6200 }
0x1099   :  { %5128 = vmatmul.mubr.msk.f32.vlgmr.msra.gmra.mrb[18].mxu0 %vm143_vm2, %v6201_v19 }
0x109a   :  { %5870 = vmatpush3.bf16.msra.mxu0 %v6334_v4  ;;  %5168 = vmatprep.mubr.msk.f32.mxu0 %vm6280_vm0, %v6281_v6 }
0x109b   :  { %5871 = vmatprep.subr.bf16.mxu0 %v6279_v3 }
0x109e   :  { %5873 = vmatpush3.bf16.msra.mxu0 %v6352_v8 }
0x109f   :  { %5874 = vmatprep.subr.bf16.mxu0 %v6279_v3 }
0x116c   :  { %v1591_v22 = vpop.f32.mrb[18].mxu0 }
0x116d   :  { %v1592_v24 = vadd.f32 %v6424_v26, %v1591_v22  ;;  %v5129_v25 = vpop.f32.mrb[19].mxu0 }
0x116f   :  { %v1596_v27 = vmul.f32 %v1595_v23, %v1592_v24  ;;  %v1746_v36 = vsub.f32 %v6627_v7, %v1592_v24 }
0x1171   :  { %v1597_v28 = vadd.f32 %v1596_v27, %v6598_v61 }
0x1173   :  { %v1598_v29 = vsub.f32 %v1597_v28, %v1446_v12 }
0x1175   :  { %5139 = vmatmul.mubr.msk.f32.vlgmr.msra.gmra.mrb[20].mxu1 %vm64_vm1, %v1598_v29 }
0x1176   :  { %5858 = vmatpush3.bf16.msra.mxu1 %v6364_v11  ;;  %5157 = vmatprep.mubr.msk.f32.mxu1 %vm6280_vm0, %v6281_v6 }
0x1177   :  { %5859 = vmatprep.subr.bf16.mxu1 %v6279_v3 }
0x117a   :  { %5861 = vmatpush3.bf16.msra.mxu1 %v6381_v14 }
0x117b   :  { %5862 = vmatprep.subr.bf16.mxu1 %v6279_v3 }
0x117e   :  { %5864 = vmatpush3.bf16.msra.mxu1 %v6391_v17 }
0x117f   :  { %5865 = vmatprep.subr.bf16.mxu1 %v6279_v3 }
0x1182   :  { %5867 = vmatpush3.bf16.msra.mxu1 %v6400_v20 }
0x1183   :  { %5886 = vmatprep.subr.bf16.mxu1 %v6279_v3 }
0x1248   :  { %v1668_v30 = vpop.f32.mrb[20].mxu1 }
0x1249   :  { %v1669_v31 = vadd.f32 %v6408_v21, %v1668_v30  ;;  %v5140_v32 = vpop.f32.mrb[21].mxu1 }
0x124b   :  { %6202 = vtanh.f32 %v1669_v31 }
0x1255   :  { %v6203_v33 = vpop.eup %6202 }
0x1256   :  { %5158 = vmatmul.mubr.msk.f32.vlgmr.msra.gmra.mrb[22].mxu1 %vm143_vm2, %v6203_v33 }
0x1257   :  { %5888 = vmatpush3.bf16.msra.mxu1 %v6334_v4  ;;  %5198 = vmatprep.mubr.msk.f32.mxu1 %vm6280_vm0, %v6281_v6 }
0x1258   :  { %5889 = vmatprep.subr.bf16.mxu1 %v6279_v3 }
0x125b   :  { %5891 = vmatpush3.bf16.msra.mxu1 %v6352_v8 }
0x125c   :  { %5892 = vmatprep.subr.bf16.mxu1 %v6279_v3 }
0x1329   :  { %v1742_v34 = vpop.f32.mrb[22].mxu1 }
0x132a   :  { %v1743_v35 = vadd.f32 %v6424_v26, %v1742_v34  ;;  %v5159_v37 = vpop.f32.mrb[23].mxu1 }
0x132c   :  { %v1747_v38 = vadd.f32 %v1746_v36, %v1743_v35  ;;  %v1897_v45 = vadd.f32 %v1743_v35, %v1592_v24 }
0x132e   :  { %v1748_v39 = vmul.f32 %v1747_v38, %v1595_v23  ;;  %v1898_v46 = vmul.f32 3.0, %v1897_v45 }
0x1330   :  { %v1749_v40 = vadd.f32 %v1748_v39, %v6598_v61  ;;  %v1899_v49 = vadd.f32 %v1898_v46, %v6627_v7 }
0x1332   :  { %5169 = vmatmul.mubr.msk.f32.vlgmr.msra.gmra.mrb[20].mxu0 %vm64_vm1, %v1749_v40 }
0x1333   :  { %5876 = vmatpush3.bf16.msra.mxu0 %v6364_v11  ;;  %5187 = vmatprep.mubr.msk.f32.mxu0 %vm6280_vm0, %v6281_v6 }
0x1334   :  { %5877 = vmatprep.subr.bf16.mxu0 %v6279_v3 }
0x1337   :  { %5879 = vmatpush3.bf16.msra.mxu0 %v6381_v14 }
0x1338   :  { %5880 = vmatprep.subr.bf16.mxu0 %v6279_v3 }
0x133b   :  { %5882 = vmatpush3.bf16.msra.mxu0 %v6391_v17 }
0x133c   :  { %5883 = vmatprep.subr.bf16.mxu0 %v6279_v3 }
0x133f   :  { %5885 = vmatpush3.bf16.msra.mxu0 %v6400_v20 }
0x1340   :  { %5904 = vmatprep.subr.bf16.mxu0 %v6279_v3 }
0x1405   :  { %v1819_v41 = vpop.f32.mrb[20].mxu0 }
0x1406   :  { %v1820_v42 = vadd.f32 %v6408_v21, %v1819_v41  ;;  %v5170_v43 = vpop.f32.mrb[21].mxu0 }
0x1407   :  { %v2515_v43 = vstv %s1912_s14 }
0x1408   :  { %6204 = vtanh.f32 %v1820_v42 }
0x1412   :  { %v6205_v44 = vpop.eup %6204 }
0x1413   :  { %5188 = vmatmul.mubr.msk.f32.vlgmr.msra.gmra.mrb[22].mxu0 %vm143_vm2, %v6205_v44 }
0x1414   :  { %5906 = vmatpush3.bf16.msra.mxu0 %v6334_v4  ;;  %5228 = vmatprep.mubr.msk.f32.mxu0 %vm6280_vm0, %v6281_v6 }
0x1415   :  { %5907 = vmatprep.subr.bf16.mxu0 %v6279_v3 }
0x1418   :  { %5909 = vmatpush3.bf16.msra.mxu0 %v6352_v8 }
0x1419   :  { %5910 = vmatprep.subr.bf16.mxu0 %v6279_v3 }
0x14e6   :  { %v1893_v47 = vpop.f32.mrb[22].mxu0 }
0x14e7   :  { %v1894_v48 = vadd.f32 %v6424_v26, %v1893_v47  ;;  %v5189_v50 = vpop.f32.mrb[23].mxu0 }
0x14e9   :  { %v1900_v52 = vadd.f32 %v1899_v49, %v1894_v48 }
0x14eb   :  { %v1902_v53 = vmul.f32 %v1901_v51, %v1900_v52  ;;  %v2669_v51 = vstv %s2520_s16 }
0x14ed   :  { %v6698_v54 = vadd.f32 %v1902_v53, %v6598_v61 }
0x14ef   :  { %5199 = vmatmul.mubr.msk.f32.vlgmr.msra.gmra.mrb[24].mxu1 %vm64_vm1, %v6698_v54 }
0x14f0   :  { %5894 = vmatpush3.bf16.msra.mxu1 %v6364_v11  ;;  %5217 = vmatprep.mubr.msk.f32.mxu1 %vm6280_vm0, %v6281_v6 }
0x14f1   :  { %5895 = vmatprep.subr.bf16.mxu1 %v6279_v3 }
0x14f4   :  { %5897 = vmatpush3.bf16.msra.mxu1 %v6381_v14 }
0x14f5   :  { %5898 = vmatprep.subr.bf16.mxu1 %v6279_v3 }
0x14f8   :  { %5900 = vmatpush3.bf16.msra.mxu1 %v6391_v17 }
0x14f9   :  { %5901 = vmatprep.subr.bf16.mxu1 %v6279_v3 }
0x14fc   :  { %5903 = vmatpush3.bf16.msra.mxu1 %v6400_v20 }
0x14fd   :  { %5922 = vmatprep.subr.bf16.mxu1 %v6279_v3 }
0x15c2   :  { %v1981_v55 = vpop.f32.mrb[24].mxu1 }
0x15c3   :  { %v1982_v56 = vadd.f32 %v6408_v21, %v1981_v55  ;;  %v5200_v57 = vpop.f32.mrb[25].mxu1 }
0x15c5   :  { %6206 = vtanh.f32 %v1982_v56 }
0x15cf   :  { %v6207_v58 = vpop.eup %6206 }
0x15d0   :  { %5218 = vmatmul.mubr.msk.f32.vlgmr.msra.gmra.mrb[26].mxu1 %vm143_vm2, %v6207_v58  ;;  %v6841_v58 = vld [vmem:[%s7110_s3] ss:$0 sm:$0xff] }
0x15d1   :  { %5924 = vmatpush3.bf16.msra.mxu1 %v6334_v4  ;;  %5258 = vmatprep.mubr.msk.f32.mxu1 %vm6280_vm0, %v6281_v6 }
0x15d2   :  { %5925 = vmatprep.subr.bf16.mxu1 %v6279_v3 }
0x15d5   :  { %5927 = vmatpush3.bf16.msra.mxu1 %v6352_v8 }
0x15d6   :  { %5928 = vmatprep.subr.bf16.mxu1 %v6279_v3 }
0x16a3   :  { %v2055_v59 = vpop.f32.mrb[26].mxu1 }
0x16a4   :  { %v6724_v61 = vadd.f32 %v6424_v26, %v2055_v59  ;;  %v5219_v62 = vpop.f32.mrb[27].mxu1 }
0x16a6   :  { %v2060_v63 = vmul.f32 %v2059_v60, %v6724_v61 }
0x16a8   :  { %v2061_v0 = vadd.f32 %v2060_v63, %v6698_v54 }
0x16aa   :  { %5229 = vmatmul.mubr.msk.f32.vlgmr.msra.gmra.mrb[24].mxu0 %vm64_vm1, %v2061_v0 }
0x16ab   :  { %5912 = vmatpush3.bf16.msra.mxu0 %v6364_v11  ;;  %5247 = vmatprep.mubr.msk.f32.mxu0 %vm6280_vm0, %v6281_v6 }
0x16ac   :  { %5913 = vmatprep.subr.bf16.mxu0 %v6279_v3 }
0x16af   :  { %5915 = vmatpush3.bf16.msra.mxu0 %v6381_v14 }
0x16b0   :  { %5916 = vmatprep.subr.bf16.mxu0 %v6279_v3 }
0x16b3   :  { %5918 = vmatpush3.bf16.msra.mxu0 %v6391_v17 }
0x16b4   :  { %5919 = vmatprep.subr.bf16.mxu0 %v6279_v3 }
0x16b7   :  { %5921 = vmatpush3.bf16.msra.mxu0 %v6400_v20 }
0x16b8   :  { %5940 = vmatprep.subr.bf16.mxu0 %v6279_v3 }
0x177d   :  { %v2131_v1 = vpop.f32.mrb[24].mxu0 }
0x177e   :  { %v2132_v2 = vadd.f32 %v6408_v21, %v2131_v1  ;;  %v5230_v5 = vpop.f32.mrb[25].mxu0 }
0x1780   :  { %6208 = vtanh.f32 %v2132_v2 }
0x178a   :  { %v6209_v9 = vpop.eup %6208 }
0x178b   :  { %5248 = vmatmul.mubr.msk.f32.vlgmr.msra.gmra.mrb[26].mxu0 %vm143_vm2, %v6209_v9 }
0x178c   :  { %5942 = vmatpush3.bf16.msra.mxu0 %v6334_v4  ;;  %5288 = vmatprep.mubr.msk.f32.mxu0 %vm6280_vm0, %v6281_v6 }
0x178d   :  { %5943 = vmatprep.subr.bf16.mxu0 %v6279_v3 }
0x1790   :  { %5945 = vmatpush3.bf16.msra.mxu0 %v6352_v8 }
0x1791   :  { %5946 = vmatprep.subr.bf16.mxu0 %v6279_v3 }
0x185e   :  { %v2205_v7 = vpop.f32.mrb[26].mxu0 }
0x185f   :  { %v2206_v12 = vadd.f32 %v6424_v26, %v2205_v7  ;;  %v5249_v13 = vpop.f32.mrb[27].mxu0 }
0x1861   :  { %v2210_v15 = vmul.f32 %v2209_v10, %v2206_v12  ;;  %v2360_v28 = vsub.f32 %v6724_v61, %v2206_v12 }
0x1863   :  { %v2211_v16 = vadd.f32 %v2210_v15, %v6698_v54  ;;  %v6876_v15 = vld [vmem:[%s7112_s5] ss:$0 sm:$0xff]  ;;  %s2521_s5 = smul.f32 0.125, %s6819_s15 }
0x1865   :  { %v2212_v18 = vsub.f32 %v2211_v16, %v2060_v63  ;;  %v2819_v63 = vstv %s6819_s15 }
0x1867   :  { %5259 = vmatmul.mubr.msk.f32.vlgmr.msra.gmra.mrb[28].mxu1 %vm64_vm1, %v2212_v18 }
0x1868   :  { %5930 = vmatpush3.bf16.msra.mxu1 %v6364_v11  ;;  %5277 = vmatprep.mubr.msk.f32.mxu1 %vm6280_vm0, %v6281_v6 }
0x1869   :  { %5931 = vmatprep.subr.bf16.mxu1 %v6279_v3 }
0x186c   :  { %5933 = vmatpush3.bf16.msra.mxu1 %v6381_v14 }
0x186d   :  { %5934 = vmatprep.subr.bf16.mxu1 %v6279_v3 }
0x1870   :  { %5936 = vmatpush3.bf16.msra.mxu1 %v6391_v17 }
0x1871   :  { %5937 = vmatprep.subr.bf16.mxu1 %v6279_v3 }
0x1874   :  { %5939 = vmatpush3.bf16.msra.mxu1 %v6400_v20 }
0x1875   :  { %5958 = vmatprep.subr.bf16.mxu1 %v6279_v3 }
0x193a   :  { %v2282_v19 = vpop.f32.mrb[28].mxu1 }
0x193b   :  { %v2283_v22 = vadd.f32 %v6408_v21, %v2282_v19  ;;  %v5260_v23 = vpop.f32.mrb[29].mxu1 }
0x193d   :  { %6210 = vtanh.f32 %v2283_v22 }
0x1947   :  { %v6211_v24 = vpop.eup %6210 }
0x1948   :  { %5278 = vmatmul.mubr.msk.f32.vlgmr.msra.gmra.mrb[30].mxu1 %vm143_vm2, %v6211_v24 }
0x1949   :  { %5960 = vmatpush3.bf16.msra.mxu1 %v6334_v4  ;;  %5318 = vmatprep.mubr.msk.f32.mxu1 %vm6280_vm0, %v6281_v6 }
0x194a   :  { %5961 = vmatprep.subr.bf16.mxu1 %v6279_v3 }
0x194d   :  { %5963 = vmatpush3.bf16.msra.mxu1 %v6352_v8 }
0x194e   :  { %5964 = vmatprep.subr.bf16.mxu1 %v6279_v3 }
0x1a1b   :  { %v2356_v25 = vpop.f32.mrb[30].mxu1 }
0x1a1c   :  { %v2357_v27 = vadd.f32 %v6424_v26, %v2356_v25  ;;  %v5279_v29 = vpop.f32.mrb[31].mxu1 }
0x1a1e   :  { %v2361_v30 = vadd.f32 %v2360_v28, %v2357_v27  ;;  %v2511_v37 = vadd.f32 %v2357_v27, %v2206_v12 }
0x1a20   :  { %v2362_v31 = vmul.f32 %v2361_v30, %v2209_v10  ;;  %v2512_v38 = vmul.f32 3.0, %v2511_v37 }
0x1a22   :  { %v2363_v32 = vadd.f32 %v2362_v31, %v6698_v54  ;;  %v2513_v41 = vadd.f32 %v2512_v38, %v6724_v61 }
0x1a24   :  { %5289 = vmatmul.mubr.msk.f32.vlgmr.msra.gmra.mrb[28].mxu0 %vm64_vm1, %v2363_v32 }
0x1a25   :  { %5948 = vmatpush3.bf16.msra.mxu0 %v6364_v11  ;;  %5307 = vmatprep.mubr.msk.f32.mxu0 %vm6280_vm0, %v6281_v6 }
0x1a26   :  { %5949 = vmatprep.subr.bf16.mxu0 %v6279_v3 }
0x1a29   :  { %5951 = vmatpush3.bf16.msra.mxu0 %v6381_v14 }
0x1a2a   :  { %5952 = vmatprep.subr.bf16.mxu0 %v6279_v3 }
0x1a2d   :  { %5954 = vmatpush3.bf16.msra.mxu0 %v6391_v17 }
0x1a2e   :  { %5955 = vmatprep.subr.bf16.mxu0 %v6279_v3 }
0x1a31   :  { %5957 = vmatpush3.bf16.msra.mxu0 %v6400_v20 }
0x1a32   :  { %5976 = vmatprep.subr.bf16.mxu0 %v6279_v3 }
0x1af7   :  { %v2433_v33 = vpop.f32.mrb[28].mxu0 }
0x1af8   :  { %v2434_v34 = vadd.f32 %v6408_v21, %v2433_v33  ;;  %v5290_v35 = vpop.f32.mrb[29].mxu0 }
0x1afa   :  { %6212 = vtanh.f32 %v2434_v34 }
0x1b04   :  { %v6213_v36 = vpop.eup %6212 }
0x1b05   :  { %5308 = vmatmul.mubr.msk.f32.vlgmr.msra.gmra.mrb[30].mxu0 %vm143_vm2, %v6213_v36  ;;  %v3125_v36 = vstv %s2521_s5 }
0x1b06   :  { %5978 = vmatpush3.bf16.msra.mxu0 %v6334_v4  ;;  %5348 = vmatprep.mubr.msk.f32.mxu0 %vm6280_vm0, %v6281_v6 }
0x1b07   :  { %5979 = vmatprep.subr.bf16.mxu0 %v6279_v3 }
0x1b0a   :  { %5981 = vmatpush3.bf16.msra.mxu0 %v6352_v8 }
0x1b0b   :  { %5982 = vmatprep.subr.bf16.mxu0 %v6279_v3 }
0x1bd8   :  { %v2507_v39 = vpop.f32.mrb[30].mxu0 }
0x1bd9   :  { %v2508_v40 = vadd.f32 %v6424_v26, %v2507_v39  ;;  %v5309_v42 = vpop.f32.mrb[31].mxu0 }
0x1bdb   :  { %v2514_v44 = vadd.f32 %v2513_v41, %v2508_v40 }
0x1bdd   :  { %v2516_v45 = vmul.f32 %v2515_v43, %v2514_v44 }
0x1bdf   :  { %v6795_v46 = vadd.f32 %v2516_v45, %v6698_v54 }
0x1be1   :  { %2518 = vst.msk [vmem:[#allocation5 + $0x8] sm:$0xff] %vm64_vm1, %v6795_v46  ;;  %5319 = vmatmul.mubr.msk.f32.vlgmr.msra.gmra.mrb[32].mxu1 %vm64_vm1, %v6795_v46 }
0x1be2   :  { %5966 = vmatpush3.bf16.msra.mxu1 %v6364_v11  ;;  %5337 = vmatprep.mubr.msk.f32.mxu1 %vm6280_vm0, %v6281_v6 }
0x1be3   :  { %5967 = vmatprep.subr.bf16.mxu1 %v6279_v3 }
0x1be6   :  { %5969 = vmatpush3.bf16.msra.mxu1 %v6381_v14 }
0x1be7   :  { %5970 = vmatprep.subr.bf16.mxu1 %v6279_v3 }
0x1bea   :  { %5972 = vmatpush3.bf16.msra.mxu1 %v6391_v17 }
0x1beb   :  { %5973 = vmatprep.subr.bf16.mxu1 %v6279_v3 }
0x1bee   :  { %5975 = vmatpush3.bf16.msra.mxu1 %v6400_v20 }
0x1bef   :  { %5994 = vmatprep.subr.bf16.mxu1 %v6279_v3 }
0x1cb4   :  { %v2591_v47 = vpop.f32.mrb[32].mxu1 }
0x1cb5   :  { %v2592_v48 = vadd.f32 %v6408_v21, %v2591_v47  ;;  %v5320_v49 = vpop.f32.mrb[33].mxu1 }
0x1cb7   :  { %6214 = vtanh.f32 %v2592_v48 }
0x1cc1   :  { %v6215_v50 = vpop.eup %6214 }
0x1cc2   :  { %5338 = vmatmul.mubr.msk.f32.vlgmr.msra.gmra.mrb[34].mxu1 %vm143_vm2, %v6215_v50 }
0x1cc3   :  { %5996 = vmatpush3.bf16.msra.mxu1 %v6334_v4  ;;  %5378 = vmatprep.mubr.msk.f32.mxu1 %vm6280_vm0, %v6281_v6 }
0x1cc4   :  { %5997 = vmatprep.subr.bf16.mxu1 %v6279_v3 }
0x1cc7   :  { %5999 = vmatpush3.bf16.msra.mxu1 %v6352_v8 }
0x1cc8   :  { %6000 = vmatprep.subr.bf16.mxu1 %v6279_v3 }
0x1d95   :  { %v2665_v21 = vpop.f32.mrb[34].mxu1 }
0x1d96   :  { %v6823_v52 = vadd.f32 %v6424_v26, %v2665_v21  ;;  %v5339_v53 = vpop.f32.mrb[35].mxu1 }
0x1d98   :  { %v2670_v55 = vmul.f32 %v2669_v51, %v6823_v52 }
0x1d9a   :  { %v2671_v56 = vadd.f32 %v2670_v55, %v6795_v46 }
0x1d9c   :  { %5349 = vmatmul.mubr.msk.f32.vlgmr.msra.gmra.mrb[32].mxu0 %vm64_vm1, %v2671_v56  ;;  %v3432_v56 = vstv %s6932_s21 }
0x1d9d   :  { %5984 = vmatpush3.bf16.msra.mxu0 %v6364_v11  ;;  %5367 = vmatprep.mubr.msk.f32.mxu0 %vm6280_vm0, %v6281_v6 }
0x1d9e   :  { %5985 = vmatprep.subr.bf16.mxu0 %v6279_v3 }
0x1da1   :  { %5987 = vmatpush3.bf16.msra.mxu0 %v6381_v14 }
0x1da2   :  { %5988 = vmatprep.subr.bf16.mxu0 %v6279_v3 }
0x1da5   :  { %5990 = vmatpush3.bf16.msra.mxu0 %v6391_v17 }
0x1da6   :  { %5991 = vmatprep.subr.bf16.mxu0 %v6279_v3 }
0x1da9   :  { %5993 = vmatpush3.bf16.msra.mxu0 %v6400_v20 }
0x1daa   :  { %6012 = vmatprep.subr.bf16.mxu0 %v6279_v3 }
0x1e6f   :  { %v2741_v57 = vpop.f32.mrb[32].mxu0 }
0x1e70   :  { %v2742_v59 = vadd.f32 %v6841_v58, %v2741_v57  ;;  %v5350_v60 = vpop.f32.mrb[33].mxu0 }
0x1e72   :  { %6216 = vtanh.f32 %v2742_v59 }
0x1e7c   :  { %v6217_v61 = vpop.eup %6216 }
0x1e7d   :  { %5368 = vmatmul.mubr.msk.f32.vlgmr.msra.gmra.mrb[34].mxu0 %vm143_vm2, %v6217_v61 }
0x1e7e   :  { %6014 = vmatpush3.bf16.msra.mxu0 %v6334_v4  ;;  %5408 = vmatprep.mubr.msk.f32.mxu0 %vm6280_vm0, %v6281_v6 }
0x1e7f   :  { %6015 = vmatprep.subr.bf16.mxu0 %v6279_v3 }
0x1e82   :  { %6017 = vmatpush3.bf16.msra.mxu0 %v6352_v8 }
0x1e83   :  { %6018 = vmatprep.subr.bf16.mxu0 %v6279_v3 }
0x1f50   :  { %v2815_v62 = vpop.f32.mrb[34].mxu0 }
0x1f51   :  { %v2816_v0 = vadd.f32 %v6424_v26, %v2815_v62  ;;  %v5369_v1 = vpop.f32.mrb[35].mxu0 }
0x1f53   :  { %v2820_v2 = vmul.f32 %v2819_v63, %v2816_v0  ;;  %v2970_v18 = vsub.f32 %v6823_v52, %v2816_v0 }
0x1f55   :  { %v2821_v5 = vadd.f32 %v2820_v2, %v6795_v46 }
0x1f57   :  { %v2822_v9 = vsub.f32 %v2821_v5, %v2670_v55 }
0x1f59   :  { %5379 = vmatmul.mubr.msk.f32.vlgmr.msra.gmra.mrb[36].mxu1 %vm64_vm1, %v2822_v9 }
0x1f5a   :  { %6002 = vmatpush3.bf16.msra.mxu1 %v6364_v11  ;;  %5397 = vmatprep.mubr.msk.f32.mxu1 %vm6280_vm0, %v6281_v6 }
0x1f5b   :  { %6003 = vmatprep.subr.bf16.mxu1 %v6279_v3 }
0x1f5e   :  { %6005 = vmatpush3.bf16.msra.mxu1 %v6381_v14 }
0x1f5f   :  { %6006 = vmatprep.subr.bf16.mxu1 %v6279_v3 }
0x1f62   :  { %6008 = vmatpush3.bf16.msra.mxu1 %v6391_v17 }
0x1f63   :  { %6009 = vmatprep.subr.bf16.mxu1 %v6279_v3 }
0x1f66   :  { %6011 = vmatpush3.bf16.msra.mxu1 %v6400_v20 }
0x1f67   :  { %6030 = vmatprep.subr.bf16.mxu1 %v6279_v3 }
0x202c   :  { %v2892_v26 = vpop.f32.mrb[36].mxu1 }
0x202d   :  { %v2893_v7 = vadd.f32 %v6841_v58, %v2892_v26  ;;  %v5380_v10 = vpop.f32.mrb[37].mxu1 }
0x202f   :  { %6218 = vtanh.f32 %v2893_v7 }
0x2039   :  { %v6219_v12 = vpop.eup %6218 }
0x203a   :  { %5398 = vmatmul.mubr.msk.f32.vlgmr.msra.gmra.mrb[38].mxu1 %vm143_vm2, %v6219_v12 }
0x203b   :  { %6032 = vmatpush3.bf16.msra.mxu1 %v6334_v4  ;;  %5438 = vmatprep.mubr.msk.f32.mxu1 %vm6280_vm0, %v6281_v6 }
0x203c   :  { %6033 = vmatprep.subr.bf16.mxu1 %v6279_v3 }
0x203f   :  { %6035 = vmatpush3.bf16.msra.mxu1 %v6352_v8 }
0x2040   :  { %6036 = vmatprep.subr.bf16.mxu1 %v6279_v3 }
0x210d   :  { %v2966_v13 = vpop.f32.mrb[38].mxu1 }
0x210e   :  { %v2967_v16 = vadd.f32 %v6876_v15, %v2966_v13  ;;  %v5399_v19 = vpop.f32.mrb[39].mxu1 }
0x2110   :  { %v2971_v22 = vadd.f32 %v2970_v18, %v2967_v16  ;;  %v3121_v30 = vadd.f32 %v2967_v16, %v2816_v0 }
0x2112   :  { %v2972_v23 = vmul.f32 %v2971_v22, %v2819_v63  ;;  %v3122_v31 = vmul.f32 3.0, %v3121_v30  ;;  %v3738_v30 = vstv %s3135_s23 }
0x2114   :  { %v2973_v24 = vadd.f32 %v2972_v23, %v6795_v46  ;;  %v3123_v34 = vadd.f32 %v3122_v31, %v6823_v52 }
0x2116   :  { %5409 = vmatmul.mubr.msk.f32.vlgmr.msra.gmra.mrb[36].mxu0 %vm64_vm1, %v2973_v24 }
0x2117   :  { %6020 = vmatpush3.bf16.msra.mxu0 %v6364_v11  ;;  %5427 = vmatprep.mubr.msk.f32.mxu0 %vm6280_vm0, %v6281_v6 }
0x2118   :  { %6021 = vmatprep.subr.bf16.mxu0 %v6279_v3 }
0x211b   :  { %6023 = vmatpush3.bf16.msra.mxu0 %v6381_v14 }
0x211c   :  { %6024 = vmatprep.subr.bf16.mxu0 %v6279_v3 }
0x211f   :  { %6026 = vmatpush3.bf16.msra.mxu0 %v6391_v17 }
0x2120   :  { %6027 = vmatprep.subr.bf16.mxu0 %v6279_v3 }
0x2123   :  { %6029 = vmatpush3.bf16.msra.mxu0 %v6400_v20 }
0x2124   :  { %6048 = vmatprep.subr.bf16.mxu0 %v6279_v3 }
0x21e9   :  { %v3043_v25 = vpop.f32.mrb[36].mxu0 }
0x21ea   :  { %v3044_v27 = vadd.f32 %v6841_v58, %v3043_v25  ;;  %v5410_v28 = vpop.f32.mrb[37].mxu0 }
0x21ec   :  { %6220 = vtanh.f32 %v3044_v27 }
0x21f6   :  { %v6221_v29 = vpop.eup %6220 }
0x21f7   :  { %5428 = vmatmul.mubr.msk.f32.vlgmr.msra.gmra.mrb[38].mxu0 %vm143_vm2, %v6221_v29 }
0x21f8   :  { %6050 = vmatpush3.bf16.msra.mxu0 %v6334_v4  ;;  %5468 = vmatprep.mubr.msk.f32.mxu0 %vm6280_vm0, %v6281_v6 }
0x21f9   :  { %6051 = vmatprep.subr.bf16.mxu0 %v6279_v3 }
0x21fc   :  { %6053 = vmatpush3.bf16.msra.mxu0 %v6352_v8 }
0x21fd   :  { %6054 = vmatprep.subr.bf16.mxu0 %v6279_v3 }
0x22ca   :  { %v3117_v32 = vpop.f32.mrb[38].mxu0 }
0x22cb   :  { %v3118_v33 = vadd.f32 %v6876_v15, %v3117_v32  ;;  %v5429_v35 = vpop.f32.mrb[39].mxu0 }
0x22cd   :  { %v3124_v37 = vadd.f32 %v3123_v34, %v3118_v33 }
0x22cf   :  { %v3126_v38 = vmul.f32 %v3125_v36, %v3124_v37 }
0x22d1   :  { %v6904_v39 = vadd.f32 %v3126_v38, %v6795_v46  ;;  %v3282_v46 = vstv %s3134_s22 }
0x22d3   :  { %3129 = vrot.lane.b32.xlu0 %v6904_v39, %s6282_s30  ;;  %5439 = vmatmul.mubr.msk.f32.vlgmr.msra.gmra.mrb[40].mxu1 %vm64_vm1, %v6904_v39 }
0x22d4   :  { %6038 = vmatpush3.bf16.msra.mxu1 %v6364_v11  ;;  %5457 = vmatprep.mubr.msk.f32.mxu1 %vm6280_vm0, %v6281_v6 }
0x22d5   :  { %6039 = vmatprep.subr.bf16.mxu1 %v6279_v3 }
0x22d7   :  { %1905 = vrot.lane.b32.xlu0 %v6698_v54, %s6284_s20 }
0x22d8   :  { %6041 = vmatpush3.bf16.msra.mxu1 %v6381_v14 }
0x22d9   :  { %6042 = vmatprep.subr.bf16.mxu1 %v6279_v3 }
0x22dc   :  { %6044 = vmatpush3.bf16.msra.mxu1 %v6391_v17 }
0x22dd   :  { %6045 = vmatprep.subr.bf16.mxu1 %v6279_v3 }
0x22e0   :  { %6047 = vmatpush3.bf16.msra.mxu1 %v6400_v20 }
0x22e1   :  { %6066 = vmatprep.subr.bf16.mxu1 %v6279_v3 }
0x2345   :  { %v3130_v40 = vpop.permute.xlu0 %3129 }
0x2346   :  { %3132 = vst.msk [vmem:[#allocation5 + $0x8] sm:$0xff] %vm680_vm3, %v3130_v40  ;;  %v3895_v40 = vstv %s3747_s25 }
0x2349   :  { %v1906_v41 = vpop.permute.xlu0 %1905 }
0x234a   :  { %1909 = vst.msk [vmem:[#allocation5] sm:$0xff] %vm1908_vm5, %v1906_v41 }
0x23a6   :  { %v3204_v54 = vpop.f32.mrb[40].mxu1 }
0x23a7   :  { %v3205_v42 = vadd.f32 %v6841_v58, %v3204_v54  ;;  %v5440_v43 = vpop.f32.mrb[41].mxu1 }
0x23a9   :  { %6222 = vtanh.f32 %v3205_v42 }
0x23b3   :  { %v6223_v44 = vpop.eup %6222 }
0x23b4   :  { %5458 = vmatmul.mubr.msk.f32.vlgmr.msra.gmra.mrb[42].mxu1 %vm143_vm2, %v6223_v44 }
0x23b5   :  { %6068 = vmatpush3.bf16.msra.mxu1 %v6334_v4  ;;  %5498 = vmatprep.mubr.msk.f32.mxu1 %vm6280_vm0, %v6281_v6 }
0x23b6   :  { %6069 = vmatprep.subr.bf16.mxu1 %v6279_v3 }
0x23b9   :  { %6071 = vmatpush3.bf16.msra.mxu1 %v6352_v8 }
0x23ba   :  { %6072 = vmatprep.subr.bf16.mxu1 %v6279_v3 }
0x2487   :  { %v3278_v45 = vpop.f32.mrb[42].mxu1 }
0x2488   :  { %v6936_v47 = vadd.f32 %v6876_v15, %v3278_v45  ;;  %v5459_v48 = vpop.f32.mrb[43].mxu1 }
0x248a   :  { %v3283_v49 = vmul.f32 %v3282_v46, %v6936_v47 }
0x248c   :  { %v3284_v50 = vadd.f32 %v3283_v49, %v6904_v39 }
0x248e   :  { %5469 = vmatmul.mubr.msk.f32.vlgmr.msra.gmra.mrb[40].mxu0 %vm64_vm1, %v3284_v50 }
0x248f   :  { %6056 = vmatpush3.bf16.msra.mxu0 %v6364_v11  ;;  %5487 = vmatprep.mubr.msk.f32.mxu0 %vm6280_vm0, %v6281_v6 }
0x2490   :  { %6057 = vmatprep.subr.bf16.mxu0 %v6279_v3 }
0x2493   :  { %6059 = vmatpush3.bf16.msra.mxu0 %v6381_v14 }
0x2494   :  { %6060 = vmatprep.subr.bf16.mxu0 %v6279_v3 }
0x2497   :  { %6062 = vmatpush3.bf16.msra.mxu0 %v6391_v17 }
0x2498   :  { %6063 = vmatprep.subr.bf16.mxu0 %v6279_v3 }
0x249b   :  { %6065 = vmatpush3.bf16.msra.mxu0 %v6400_v20 }
0x249c   :  { %6084 = vmatprep.subr.bf16.mxu0 %v6279_v3 }
0x2561   :  { %v3354_v21 = vpop.f32.mrb[40].mxu0 }
0x2562   :  { %v3355_v51 = vadd.f32 %v6841_v58, %v3354_v21  ;;  %v5470_v52 = vpop.f32.mrb[41].mxu0 }
0x2564   :  { %6224 = vtanh.f32 %v3355_v51 }
0x256e   :  { %v6225_v53 = vpop.eup %6224 }
0x256f   :  { %5488 = vmatmul.mubr.msk.f32.vlgmr.msra.gmra.mrb[42].mxu0 %vm143_vm2, %v6225_v53 }
0x2570   :  { %6086 = vmatpush3.bf16.msra.mxu0 %v6334_v4  ;;  %5528 = vmatprep.mubr.msk.f32.mxu0 %vm6280_vm0, %v6281_v6 }
0x2571   :  { %6087 = vmatprep.subr.bf16.mxu0 %v6279_v3 }
0x2574   :  { %6089 = vmatpush3.bf16.msra.mxu0 %v6352_v8 }
0x2575   :  { %6090 = vmatprep.subr.bf16.mxu0 %v6279_v3 }
0x2642   :  { %v3428_v55 = vpop.f32.mrb[42].mxu0 }
0x2643   :  { %v3429_v57 = vadd.f32 %v6876_v15, %v3428_v55  ;;  %v5489_v59 = vpop.f32.mrb[43].mxu0 }
0x2645   :  { %v3433_v60 = vmul.f32 %v3432_v56, %v3429_v57  ;;  %v3583_v26 = vsub.f32 %v6936_v47, %v3429_v57 }
0x2647   :  { %v3434_v61 = vadd.f32 %v3433_v60, %v6904_v39 }
0x2649   :  { %v3435_v62 = vsub.f32 %v3434_v61, %v3283_v49  ;;  %v4045_v49 = vstv %s7032_s24 }
0x264b   :  { %5499 = vmatmul.mubr.msk.f32.vlgmr.msra.gmra.mrb[44].mxu1 %vm64_vm1, %v3435_v62 }
0x264c   :  { %6074 = vmatpush3.bf16.msra.mxu1 %v6364_v11  ;;  %5517 = vmatprep.mubr.msk.f32.mxu1 %vm6280_vm0, %v6281_v6 }
0x264d   :  { %6075 = vmatprep.subr.bf16.mxu1 %v6279_v3 }
0x2650   :  { %6077 = vmatpush3.bf16.msra.mxu1 %v6381_v14 }
0x2651   :  { %6078 = vmatprep.subr.bf16.mxu1 %v6279_v3 }
0x2654   :  { %6080 = vmatpush3.bf16.msra.mxu1 %v6391_v17 }
0x2655   :  { %6081 = vmatprep.subr.bf16.mxu1 %v6279_v3 }
0x2658   :  { %6083 = vmatpush3.bf16.msra.mxu1 %v6400_v20 }
0x2659   :  { %6102 = vmatprep.subr.bf16.mxu1 %v6279_v3 }
0x271e   :  { %v3505_v63 = vpop.f32.mrb[44].mxu1 }
0x271f   :  { %v3506_v0 = vadd.f32 %v6841_v58, %v3505_v63  ;;  %v5500_v1 = vpop.f32.mrb[45].mxu1 }
0x2721   :  { %6226 = vtanh.f32 %v3506_v0 }
0x272b   :  { %v6227_v2 = vpop.eup %6226 }
0x272c   :  { %5518 = vmatmul.mubr.msk.f32.vlgmr.msra.gmra.mrb[46].mxu1 %vm143_vm2, %v6227_v2 }
0x272d   :  { %6104 = vmatpush3.bf16.msra.mxu1 %v6334_v4  ;;  %5558 = vmatprep.mubr.msk.f32.mxu1 %vm6280_vm0, %v6281_v6 }
0x272e   :  { %6105 = vmatprep.subr.bf16.mxu1 %v6279_v3 }
0x2731   :  { %6107 = vmatpush3.bf16.msra.mxu1 %v6352_v8 }
0x2732   :  { %6108 = vmatprep.subr.bf16.mxu1 %v6279_v3 }
0x27ff   :  { %v3579_v5 = vpop.f32.mrb[46].mxu1 }
0x2800   :  { %v3580_v9 = vadd.f32 %v6876_v15, %v3579_v5  ;;  %v5519_v7 = vpop.f32.mrb[47].mxu1 }
0x2802   :  { %v3584_v10 = vadd.f32 %v3583_v26, %v3580_v9  ;;  %v3734_v23 = vadd.f32 %v3580_v9, %v3429_v57 }
0x2804   :  { %v3585_v12 = vmul.f32 %v3584_v10, %v3432_v56  ;;  %v3735_v24 = vmul.f32 3.0, %v3734_v23 }
0x2806   :  { %v3586_v13 = vadd.f32 %v3585_v12, %v6904_v39  ;;  %v3736_v28 = vadd.f32 %v3735_v24, %v6936_v47 }
0x2808   :  { %5529 = vmatmul.mubr.msk.f32.vlgmr.msra.gmra.mrb[44].mxu0 %vm64_vm1, %v3586_v13 }
0x2809   :  { %6092 = vmatpush3.bf16.msra.mxu0 %v6364_v11  ;;  %5547 = vmatprep.mubr.msk.f32.mxu0 %vm6280_vm0, %v6281_v6 }
0x280a   :  { %6093 = vmatprep.subr.bf16.mxu0 %v6279_v3 }
0x280d   :  { %6095 = vmatpush3.bf16.msra.mxu0 %v6381_v14 }
0x280e   :  { %6096 = vmatprep.subr.bf16.mxu0 %v6279_v3 }
0x2811   :  { %6098 = vmatpush3.bf16.msra.mxu0 %v6391_v17 }
0x2812   :  { %6099 = vmatprep.subr.bf16.mxu0 %v6279_v3 }
0x2815   :  { %6101 = vmatpush3.bf16.msra.mxu0 %v6400_v20 }
0x2816   :  { %6120 = vmatprep.subr.bf16.mxu0 %v6279_v3 }
0x28db   :  { %v3656_v16 = vpop.f32.mrb[44].mxu0 }
0x28dc   :  { %v3657_v18 = vadd.f32 %v6841_v58, %v3656_v16  ;;  %v5530_v19 = vpop.f32.mrb[45].mxu0 }
0x28de   :  { %6228 = vtanh.f32 %v3657_v18 }
0x28e8   :  { %v6229_v22 = vpop.eup %6228 }
0x28e9   :  { %5548 = vmatmul.mubr.msk.f32.vlgmr.msra.gmra.mrb[46].mxu0 %vm143_vm2, %v6229_v22 }
0x28ea   :  { %6122 = vmatpush3.bf16.msra.mxu0 %v6334_v4  ;;  %5588 = vmatprep.mubr.msk.f32.mxu0 %vm6280_vm0, %v6281_v6 }
0x28eb   :  { %6123 = vmatprep.subr.bf16.mxu0 %v6279_v3 }
0x28ee   :  { %6125 = vmatpush3.bf16.msra.mxu0 %v6352_v8 }
0x28ef   :  { %6126 = vmatprep.subr.bf16.mxu0 %v6279_v3 }
0x29bc   :  { %v3730_v25 = vpop.f32.mrb[46].mxu0 }
0x29bd   :  { %v3731_v27 = vadd.f32 %v6876_v15, %v3730_v25  ;;  %v5549_v29 = vpop.f32.mrb[47].mxu0 }
0x29bf   :  { %v3737_v31 = vadd.f32 %v3736_v28, %v3731_v27 }
0x29c1   :  { %v3739_v32 = vmul.f32 %v3738_v30, %v3737_v31 }
0x29c3   :  { %v7007_v33 = vadd.f32 %v3739_v32, %v6904_v39 }
0x29c5   :  { %3742 = vrot.lane.b32.xlu1 %v7007_v33, %s6283_s10  ;;  %5559 = vmatmul.mubr.msk.f32.vlgmr.msra.gmra.mrb[48].mxu1 %vm64_vm1, %v7007_v33 }
0x29c6   :  { %6110 = vmatpush3.bf16.msra.mxu1 %v6364_v11  ;;  %5577 = vmatprep.mubr.msk.f32.mxu1 %vm6280_vm0, %v6281_v6 }
0x29c7   :  { %6111 = vmatprep.subr.bf16.mxu1 %v6279_v3 }
0x29ca   :  { %6113 = vmatpush3.bf16.msra.mxu1 %v6381_v14 }
0x29cb   :  { %6114 = vmatprep.subr.bf16.mxu1 %v6279_v3 }
0x29ce   :  { %6116 = vmatpush3.bf16.msra.mxu1 %v6391_v17 }
0x29cf   :  { %6117 = vmatprep.subr.bf16.mxu1 %v6279_v3 }
0x29d2   :  { %6119 = vmatpush3.bf16.msra.mxu1 %v6400_v20 }
0x29d3   :  { %6138 = vmatprep.subr.bf16.mxu1 %v6279_v3 }
0x2a37   :  { %v3743_v34 = vpop.permute.xlu1 %3742 }
0x2a38   :  { %3745 = vst.msk [vmem:[#allocation5 + $0x8] sm:$0xff] %vm1294_vm4, %v3743_v34 }
0x2a98   :  { %v3817_v35 = vpop.f32.mrb[48].mxu1 }
0x2a99   :  { %v3818_v36 = vadd.f32 %v6841_v58, %v3817_v35  ;;  %v5560_v37 = vpop.f32.mrb[49].mxu1 }
0x2a9b   :  { %6230 = vtanh.f32 %v3818_v36 }
0x2aa5   :  { %v6231_v38 = vpop.eup %6230 }
0x2aa6   :  { %5578 = vmatmul.mubr.msk.f32.vlgmr.msra.gmra.mrb[50].mxu1 %vm143_vm2, %v6231_v38 }
0x2aa7   :  { %6140 = vmatpush3.bf16.msra.mxu1 %v6334_v4  ;;  %5618 = vmatprep.mubr.msk.f32.mxu1 %vm6280_vm0, %v6281_v6 }
0x2aa8   :  { %6141 = vmatprep.subr.bf16.mxu1 %v6279_v3 }
0x2aab   :  { %6143 = vmatpush3.bf16.msra.mxu1 %v6352_v8 }
0x2aac   :  { %6144 = vmatprep.subr.bf16.mxu1 %v6279_v3 }
0x2b79   :  { %v3891_v39 = vpop.f32.mrb[50].mxu1 }
0x2b7a   :  { %v7036_v41 = vadd.f32 %v6876_v15, %v3891_v39  ;;  %v5579_v54 = vpop.f32.mrb[51].mxu1 }
0x2b7c   :  { %v3896_v42 = vmul.f32 %v3895_v40, %v7036_v41 }
0x2b7e   :  { %v3897_v43 = vadd.f32 %v3896_v42, %v7007_v33 }
0x2b80   :  { %5589 = vmatmul.mubr.msk.f32.vlgmr.msra.gmra.mrb[48].mxu0 %vm64_vm1, %v3897_v43 }
0x2b81   :  { %6128 = vmatpush3.bf16.msra.mxu0 %v6364_v11  ;;  %5607 = vmatprep.mubr.msk.f32.mxu0 %vm6280_vm0, %v6281_v6 }
0x2b82   :  { %6129 = vmatprep.subr.bf16.mxu0 %v6279_v3 }
0x2b85   :  { %6131 = vmatpush3.bf16.msra.mxu0 %v6381_v14 }
0x2b86   :  { %6132 = vmatprep.subr.bf16.mxu0 %v6279_v3 }
0x2b89   :  { %6134 = vmatpush3.bf16.msra.mxu0 %v6391_v17 }
0x2b8a   :  { %6135 = vmatprep.subr.bf16.mxu0 %v6279_v3 }
0x2b8d   :  { %6137 = vmatpush3.bf16.msra.mxu0 %v6400_v20 }
0x2b8e   :  { %6156 = vmatprep.subr.bf16.mxu0 %v6279_v3 }
0x2c53   :  { %v3967_v44 = vpop.f32.mrb[48].mxu0 }
0x2c54   :  { %v3968_v45 = vadd.f32 %v6841_v58, %v3967_v44  ;;  %v5590_v46 = vpop.f32.mrb[49].mxu0 }
0x2c56   :  { %6232 = vtanh.f32 %v3968_v45 }
0x2c60   :  { %v6233_v47 = vpop.eup %6232 }
0x2c61   :  { %5608 = vmatmul.mubr.msk.f32.vlgmr.msra.gmra.mrb[50].mxu0 %vm143_vm2, %v6233_v47 }
0x2c62   :  { %6158 = vmatpush3.bf16.msra.mxu0 %v6334_v4  ;;  %5648 = vmatprep.mubr.msk.f32.mxu0 %vm6280_vm0, %v6281_v6 }
0x2c63   :  { %6159 = vmatprep.subr.bf16.mxu0 %v6279_v3 }
0x2c66   :  { %6161 = vmatpush3.bf16.msra.mxu0 %v6352_v8 }
0x2c67   :  { %6162 = vmatprep.subr.bf16.mxu0 %v6279_v3 }
0x2d34   :  { %v4041_v48 = vpop.f32.mrb[50].mxu0 }
0x2d35   :  { %v4042_v50 = vadd.f32 %v6876_v15, %v4041_v48  ;;  %v5609_v21 = vpop.f32.mrb[51].mxu0 }
0x2d37   :  { %v4046_v51 = vmul.f32 %v4045_v49, %v4042_v50  ;;  %v4196_v60 = vsub.f32 %v7036_v41, %v4042_v50 }
0x2d39   :  { %v4047_v52 = vadd.f32 %v4046_v51, %v7007_v33 }
0x2d3b   :  { %v4048_v53 = vsub.f32 %v4047_v52, %v3896_v42 }
0x2d3d   :  { %5619 = vmatmul.mubr.msk.f32.vlgmr.msra.gmra.mrb[52].mxu1 %vm64_vm1, %v4048_v53 }
0x2d3e   :  { %6146 = vmatpush3.bf16.msra.mxu1 %v6364_v11  ;;  %5637 = vmatprep.mubr.msk.f32.mxu1 %vm6280_vm0, %v6281_v6 }
0x2d3f   :  { %6147 = vmatprep.subr.bf16.mxu1 %v6279_v3 }
0x2d42   :  { %6149 = vmatpush3.bf16.msra.mxu1 %v6381_v14 }
0x2d43   :  { %6150 = vmatprep.subr.bf16.mxu1 %v6279_v3 }
0x2d46   :  { %6152 = vmatpush3.bf16.msra.mxu1 %v6391_v17 }
0x2d47   :  { %6153 = vmatprep.subr.bf16.mxu1 %v6279_v3 }
0x2d4a   :  { %6155 = vmatpush3.bf16.msra.mxu1 %v6400_v20 }
0x2e10   :  { %v4118_v4 = vpop.f32.mrb[52].mxu1 }
0x2e11   :  { %v4119_v8 = vadd.f32 %v6841_v58, %v4118_v4  ;;  %v5620_v55 = vpop.f32.mrb[53].mxu1 }
0x2e13   :  { %6234 = vtanh.f32 %v4119_v8 }
0x2e1d   :  { %v6235_v56 = vpop.eup %6234 }
0x2e1e   :  { %5638 = vmatmul.mubr.msk.f32.vlgmr.msra.gmra.mrb[54].mxu1 %vm143_vm2, %v6235_v56 }
0x2ef1   :  { %v4192_v57 = vpop.f32.mrb[54].mxu1 }
0x2ef2   :  { %v4193_v59 = vadd.f32 %v6876_v15, %v4192_v57  ;;  %v5639_v61 = vpop.f32.mrb[55].mxu1 }
0x2ef4   :  { %v4197_v62 = vadd.f32 %v4196_v60, %v4193_v59 }
0x2ef6   :  { %v4198_v63 = vmul.f32 %v4197_v62, %v4045_v49 }
0x2ef8   :  { %v4199_v0 = vadd.f32 %v4198_v63, %v7007_v33 }
0x2efa   :  { %5649 = vmatmul.mubr.msk.f32.vlgmr.msra.gmra.mrb[52].mxu0 %vm64_vm1, %v4199_v0 }
0x2efb   :  { %6164 = vmatpush3.bf16.msra.mxu0 %v6364_v11  ;;  %5667 = vmatprep.mubr.msk.f32.mxu0 %vm6280_vm0, %v6281_v6  ;;  %v4347_v6 = vadd.f32 %v4193_v59, %v4042_v50 }
0x2efc   :  { %6165 = vmatprep.subr.bf16.mxu0 %v6279_v3 }
0x2efd   :  { %v4348_v9 = vmul.f32 3.0, %v4347_v6 }
0x2eff   :  { %6167 = vmatpush3.bf16.msra.mxu0 %v6381_v14 }
0x2f00   :  { %6168 = vmatprep.subr.bf16.mxu0 %v6279_v3 }
0x2f03   :  { %6170 = vmatpush3.bf16.msra.mxu0 %v6391_v17  ;;  %v4349_v17 = vadd.f32 %v4348_v9, %v7036_v41 }
0x2f04   :  { %6171 = vmatprep.subr.bf16.mxu0 %v6279_v3  ;;  %v4351_v3 = vstv %s3748_s26 }
0x2f07   :  { %6173 = vmatpush3.bf16.msra.mxu0 %v6400_v20 }
0x2fcd   :  { %v4269_v1 = vpop.f32.mrb[52].mxu0 }
0x2fce   :  { %v4270_v2 = vadd.f32 %v6841_v58, %v4269_v1  ;;  %v5650_v11 = vpop.f32.mrb[53].mxu0 }
0x2fd0   :  { %6236 = vtanh.f32 %v4270_v2 }
0x2fda   :  { %v6237_v5 = vpop.eup %6236 }
0x2fdb   :  { %5668 = vmatmul.mubr.msk.f32.vlgmr.msra.gmra.mrb[54].mxu0 %vm143_vm2, %v6237_v5 }
0x30ae   :  { %v4343_v14 = vpop.f32.mrb[54].mxu0 }
0x30af   :  { %v4344_v26 = vadd.f32 %v6876_v15, %v4343_v14  ;;  %v5669_v7 = vpop.f32.mrb[55].mxu0 }
0x30b1   :  { %v4350_v10 = vadd.f32 %v4349_v17, %v4344_v26 }
0x30b3   :  { %v4352_v20 = vmul.f32 %v4351_v3, %v4350_v10 }
0x30b5   :  { %v4353_v12 = vadd.f32 %v4352_v20, %v7007_v33 }
0x30b7   :  { %4355 = vrot.lane.b32.xlu1 %v4353_v12, %s6284_s20 }
0x3129   :  { %v4356_v58 = vpop.permute.xlu1 %4355 }
0x312a   :  { %4358 = vst.msk [vmem:[#allocation5 + $0x8] sm:$0xff] %vm1908_vm5, %v4356_v58 }
0x312b   :  { %6263 = shalt.err (!%p6260_p9)
}
0x312c   :  { %s6264_s30 = scalar_lea.hbm %s7113_s6, 256 }
0x312d   :  { %p6265_p10 = scmp.ne.s32.totalorder %s7113_s6, %s6264_s30  ;;  %p6268_p11 = scmp.lt.u32.totalorder %s6264_s30, %s7113_s6 }
0x312f   :  { %p6270_p12 = pnand %p6268_p11, %p6265_p10 }
0x3131   :  { %6273 = shalt.err (!%p6270_p12)
}
0x3132   :  { %4368 = dma.vmem_to_hbm [thread:$0]  %s4366_s27, 256, %s7113_s6, [#allocation3]  }
0x3133   :  { %6276 = dma.done.wait [#allocation3], 256  }
0x3134   :  { %6277 = vsyncadd [#allocation3], 4294967040 }
0x3135   :  { %4372 = vsyncpa [#allocation3], 1 }
0x3136   :  { %4373 = vsyncpa [#allocation4], 1 }

</bundles_post_ra>
